<compile_context>
chip_gen: v7x
topology: tpu7x:2x2x1
jax: 0.10.0
libtpu: 0.0.40
codegen_flags: <defaults>
</compile_context>

<pallas_src>
from dataclasses import dataclass

import jax
import jax.numpy as jnp
from jax import lax
from jax.experimental import pallas as pl
from jax.experimental.pallas import tpu as pltpu  # noqa: F401

# ----------------------------- model dims -----------------------------------
B = 2          # batch
L_TEXT = 8     # text sequence length
N_VIS = 4      # number of visual tokens (boxes)
T = L_TEXT + N_VIS
BT = B * T     # all tokens of one encoder, batch folded into rows
H = 32         # hidden size
NH = 4         # attention heads
HD = H // NH   # head dim
FFN = 64       # feed-forward size
VOCAB = 100
VIS_FEAT = 16  # visual feature dim
BOX_DIM = 4    # box coordinate dim
NUM_ENC = 2    # question + passage encoder (both inside ONE pallas_call)
LN_EPS = 1e-5  # TODO(synk): match the real CVLEP encoder's LayerNorm epsilon.


# ----------------------------- Pallas kernel --------------------------------
def fused_dual_encoder_kernel(
    x_ref,      # (E, BT, H)       f32   combined text+visual embeddings
    bias_ref,   # (E, BT, BT)      f32   additive attn bias (0 / -1e9), block-diag
    pool_ref,   # (E, B, BT)       f32   block-diag masked-mean pooling matrix
    wqkv_ref,   # (E, H, 3*H)      bf16  fused QKV (Q pre-scaled by 1/sqrt(HD))
    wo_ref,     # (E, H, H)        bf16  output projection (rows grouped by head)
    w1_ref,     # (E, H, FFN)      bf16
    w2_ref,     # (E, FFN, H)      bf16
    vecs_ref,   # (E, 6, FFN)      f32   [b1 | b2 | ln1_g | ln1_b | ln2_g | ln2_b]
    out_ref,    # (E, B, H)        f32   pooled output
):
    f32 = jnp.float32
    bf16 = jnp.bfloat16

    def layer_norm(y, gamma, beta):
        mu = jnp.mean(y, axis=-1, keepdims=True)
        d = y - mu
        var = jnp.mean(d * d, axis=-1, keepdims=True)
        return d * lax.rsqrt(var + LN_EPS) * gamma + beta

    pooled_all = []
    # Tiny unrolled loop over the two encoders (leading-axis indexing is free).
    for e in range(NUM_ENC):
        x = x_ref[e]               # (BT, H) f32
        bias = bias_ref[e]         # (BT, BT) f32
        poolmat = pool_ref[e]      # (B, BT) f32
        wqkv = wqkv_ref[e]         # (H, 3*H) bf16
        wo = wo_ref[e]             # (H, H) bf16
        w1 = w1_ref[e]             # (H, FFN) bf16
        w2 = w2_ref[e]             # (FFN, H) bf16
        vecs = vecs_ref[e]         # (6, FFN) f32
        b1 = vecs[0:1, :]          # (1, FFN)
        b2 = vecs[1:2, :H]         # (1, H)
        ln1g = vecs[2:3, :H]
        ln1b = vecs[3:4, :H]
        ln2g = vecs[4:5, :H]
        ln2b = vecs[5:6, :H]

        # --- fused QKV: ONE 2-D MXU matmul for all B*T tokens ----------------
        x_bf = x.astype(bf16)
        qkv = jnp.dot(x_bf, wqkv, preferred_element_type=f32)    # (BT, 3*H)

        # Carve per-head Q|K|V lane blocks; heads stacked on a leading axis so
        # scores / softmax / AV are single head-batched einsums.
        qkv_h = jnp.concatenate(
            [qkv[None, :, n * 3 * HD:(n + 1) * 3 * HD] for n in range(NH)],
            axis=0)                                              # (NH, BT, 3*HD)
        qh = qkv_h[:, :, 0:HD].astype(bf16)                      # (NH, BT, HD)
        kh = qkv_h[:, :, HD:2 * HD].astype(bf16)
        vh = qkv_h[:, :, 2 * HD:3 * HD].astype(bf16)

        # --- attention over all B*T rows; bias masks padding AND cross-batch -
        # (query scale already folded into wqkv host-side)
        s = jnp.einsum("ntd,nsd->nts", qh, kh,
                       preferred_element_type=f32)               # (NH, BT, BT)
        s = s + bias[None]
        s = s - jnp.max(s, axis=-1, keepdims=True)
        p = jnp.exp(s)
        p = p * pl.reciprocal(jnp.sum(p, axis=-1, keepdims=True), approx=True)

        o = jnp.einsum("nts,nsd->ntd", p.astype(bf16), vh,
                       preferred_element_type=f32)               # (NH, BT, HD)

        # --- head reduction fused into the output projection -----------------
        o2d = jnp.concatenate([o[n] for n in range(NH)], axis=-1)  # (BT, H)
        attn_out = jnp.dot(o2d.astype(bf16), wo,
                           preferred_element_type=f32)             # (BT, H)

        # --- residual + LN + FFN + LN (f32 math, bf16 MXU operands) ----------
        x1 = layer_norm(x + attn_out, ln1g, ln1b)
        h1 = jnp.dot(x1.astype(bf16), w1, preferred_element_type=f32) + b1
        h1 = jnp.maximum(h1, 0.0)
        ffn = jnp.dot(h1.astype(bf16), w2, preferred_element_type=f32) + b2
        x2 = layer_norm(x1 + ffn, ln2g, ln2b)

        # --- masked average pooling ('avg' pool_strategy), EXACT divide ------
        pooled = jnp.dot(poolmat, x2, preferred_element_type=f32)   # (B, H)
        denom = jnp.maximum(jnp.sum(poolmat, axis=-1, keepdims=True), 1.0)
        pooled_all.append(pooled / denom)

    # Single store for both encoders.
    out_ref[...] = jnp.stack(pooled_all, axis=0)                    # (E, B, H)


def dual_encoder_layer_pool(x, mask, wqkv, wo, w1, w2, vecs):
    """x: (2, B, T, H) f32; mask: (2, B, T) f32; weights stacked over the two
    encoders on axis 0.  Returns pooled (2, B, H) f32."""
    E = x.shape[0]
    x2d = x.reshape(E, B * T, H)

    # Additive attention bias: 0 where key is in the SAME batch element and not
    # padded, -1e9 otherwise (block-diagonal over batches, built once per call).
    same_batch = jnp.kron(jnp.eye(B, dtype=jnp.float32),
                          jnp.ones((T, T), jnp.float32))            # (BT, BT)
    key_valid = mask.reshape(E, 1, B * T)                           # (E, 1, BT)
    bias = (same_batch[None] * key_valid - 1.0) * 1e9               # (E, BT, BT)

    # Block-diagonal pooling matrix: pool[e, b, b*T + t] = mask[e, b, t].
    poolmat = (jnp.eye(B, dtype=jnp.float32)[None, :, :, None]
               * mask[:, :, None, :]).reshape(E, B, B * T)          # (E, B, BT)

    # No grid: single invocation, full arrays in VMEM (working set ~40 KB).
    out = pl.pallas_call(
        fused_dual_encoder_kernel,
        out_shape=jax.ShapeDtypeStruct((E, B, H), jnp.float32),
    )(x2d, bias, poolmat, wqkv, wo, w1, w2, vecs)
    return out                                                      # (E, B, H)


# ----------------------------- parameter setup -------------------------------
def _normal(key, shape, std=0.05):
    return jax.random.normal(key, shape, dtype=jnp.float32) * std


def make_encoder_params(key):
    ks = jax.random.split(key, 6)
    wq = _normal(ks[0], (H, H))
    wk = _normal(ks[1], (H, H))
    wv = _normal(ks[2], (H, H))
    wo = _normal(ks[3], (H, H))
    w1 = _normal(ks[4], (H, FFN))
    w2 = _normal(ks[5], (FFN, H))
    b1 = jnp.zeros((FFN,), jnp.float32)
    b2 = jnp.zeros((H,), jnp.float32)
    ln1_g = jnp.ones((H,), jnp.float32)
    ln1_b = jnp.zeros((H,), jnp.float32)
    ln2_g = jnp.ones((H,), jnp.float32)
    ln2_b = jnp.zeros((H,), jnp.float32)

    # Host-side one-time rearrangement into the fused kernel layout:
    # columns [n*3*HD : n*3*HD+HD] = Q of head n (pre-scaled by 1/sqrt(HD)),
    # next HD columns = K, next HD = V.
    def fused_qkv(wq, wk, wv):
        scale = 1.0 / (HD ** 0.5)
        rq = (wq * scale).reshape(H, NH, HD)
        rk = wk.reshape(H, NH, HD)
        rv = wv.reshape(H, NH, HD)
        return jnp.concatenate([rq, rk, rv], axis=-1).reshape(H, NH * 3 * HD)

    pad = lambda v: jnp.pad(v, (0, FFN - v.shape[0]))
    vecs = jnp.stack(
        [b1, pad(b2), pad(ln1_g), pad(ln1_b), pad(ln2_g), pad(ln2_b)],
        axis=0).astype(jnp.float32)                                 # (6, FFN)

    return {
        "wqkv": fused_qkv(wq, wk, wv).astype(jnp.bfloat16),         # (H, 3*H)
        "wo": wo.astype(jnp.bfloat16),                              # (H, H)
        "w1": w1.astype(jnp.bfloat16),
        "w2": w2.astype(jnp.bfloat16),
        "vecs": vecs,
    }


def make_shared_params(key):
    ks = jax.random.split(key, 3)
    return {
        "embed_tokens": _normal(ks[0], (VOCAB, H), std=0.1),  # share_embedding
        "w_vis_feat": _normal(ks[1], (VIS_FEAT, H)),          # share_vis_embedding
        "w_vis_box": _normal(ks[2], (BOX_DIM, H)),
    }


@dataclass
class Config:
    share_vis_embedding: bool = True
    share_embedding: bool = True


# ----------------------------- CVLEP wrapper ---------------------------------
class CVLEPPallas:
    def __init__(self, config, shared_params, q_params, p_params):
        self.config = config
        # share_embedding / share_vis_embedding: both encoders use the same
        # tables (mirrors set_input_embeddings / set_vis_embedding in PyTorch).
        # TODO(synk): non-shared embedding tables (config flags False) would
        # need per-encoder tables here.
        self.shared = shared_params
        # Stack the two encoders' weights along a leading axis of 2 so both
        # encoders run inside ONE pallas_call.
        self.stacked = {k: jnp.stack([q_params[k], p_params[k]], axis=0)
                        for k in q_params}

    def _embed(self, input_ids, attention_mask, vis_inputs):
        vis_feats, boxes = vis_inputs
        # glue: token embedding lookup (gather)
        tok_emb = jnp.take(self.shared["embed_tokens"], input_ids, axis=0)
        # glue: visual embedding = feats @ W_feat + boxes @ W_box
        vis_emb = (jnp.einsum("bvf,fh->bvh", vis_feats, self.shared["w_vis_feat"])
                   + jnp.einsum("bvd,dh->bvh", boxes, self.shared["w_vis_box"]))
        x = jnp.concatenate([tok_emb, vis_emb], axis=1).astype(jnp.float32)
        vis_mask = jnp.ones((input_ids.shape[0], N_VIS), jnp.float32)
        mask = jnp.concatenate(
            [attention_mask.astype(jnp.float32), vis_mask], axis=1)  # (B, T)
        return x, mask

    def forward(self,
                question_input_ids=None, question_attention_mask=None,
                question_vis_inputs=None,
                passage_input_ids=None, passage_attention_mask=None,
                passage_vis_inputs=None, task="IR"):
        # TODO(synk): `task` only selects prompt formatting in the original
        # encoders; it does not change the math implemented here.
        xq, mq = self._embed(question_input_ids, question_attention_mask,
                             question_vis_inputs)
        xp, mp = self._embed(passage_input_ids, passage_attention_mask,
                             passage_vis_inputs)
        x = jnp.stack([xq, xp], axis=0)       # (2, B, T, H)
        m = jnp.stack([mq, mp], axis=0)       # (2, B, T)
        w = self.stacked
        pooled = dual_encoder_layer_pool(
            x, m, w["wqkv"], w["wo"], w["w1"], w["w2"], w["vecs"])
        return pooled[0], pooled[1]


# ----------------------------- main ------------------------------------------
if __name__ == "__main__":
    root = jax.random.PRNGKey(0)
    k_shared, k_qenc, k_penc, k_data = jax.random.split(root, 4)

    config = Config()
    model = CVLEPPallas(
        config,
        shared_params=make_shared_params(k_shared),
        q_params=make_encoder_params(k_qenc),
        p_params=make_encoder_params(k_penc),
    )

    kd = jax.random.split(k_data, 8)
    q_ids = jax.random.randint(kd[0], (B, L_TEXT), 0, VOCAB)
    q_mask = jnp.concatenate(
        [jnp.ones((B, L_TEXT - 2), jnp.float32),
         jnp.zeros((B, 2), jnp.float32)], axis=1)         # last 2 tokens padded
    q_vis = jax.random.normal(kd[1], (B, N_VIS, VIS_FEAT), jnp.float32)
    q_box = jax.random.uniform(kd[2], (B, N_VIS, BOX_DIM), jnp.float32)

    p_ids = jax.random.randint(kd[3], (B, L_TEXT), 0, VOCAB)
    p_mask = jnp.ones((B, L_TEXT), jnp.float32)
    p_vis = jax.random.normal(kd[4], (B, N_VIS, VIS_FEAT), jnp.float32)
    p_box = jax.random.uniform(kd[5], (B, N_VIS, BOX_DIM), jnp.float32)

    out_q, out_p = model.forward(
        question_input_ids=q_ids,
        question_attention_mask=q_mask,
        question_vis_inputs=(q_vis, q_box),
        passage_input_ids=p_ids,
        passage_attention_mask=p_mask,
        passage_vis_inputs=(p_vis, p_box),
        task="IR",
    )
    jax.block_until_ready((out_q, out_p))
    assert out_q.shape == (B, H) and out_p.shape == (B, H)
    assert jnp.all(jnp.isfinite(out_q)) and jnp.all(jnp.isfinite(out_p))
    print("KERNEL_OK")
</pallas_src>

<mosaic_0001>
module attributes {stable_mosaic.version = 11 : i64} {
  func.func @fused_dual_encoder_kernel(%arg0: memref<2x24x32xf32, #tpu.memory_space<vmem>>, %arg1: memref<2x24x24xf32, #tpu.memory_space<vmem>>, %arg2: memref<2x2x24xf32, #tpu.memory_space<vmem>>, %arg3: memref<2x32x96xbf16, #tpu.memory_space<vmem>>, %arg4: memref<2x32x32xbf16, #tpu.memory_space<vmem>>, %arg5: memref<2x32x64xbf16, #tpu.memory_space<vmem>>, %arg6: memref<2x64x32xbf16, #tpu.memory_space<vmem>>, %arg7: memref<2x6x64xf32, #tpu.memory_space<vmem>>, %arg8: memref<2x2x32xf32, #tpu.memory_space<vmem>>) attributes {dimension_semantics = [], scalar_prefetch = 0 : i64, scratch_operands = 0 : i64, tpu.core_type = #tpu.core_type<tc>} {
    %c0 = arith.constant 0 : index
    %c0_0 = arith.constant 0 : index
    %c0_1 = arith.constant 0 : index
    %0 = vector.load %arg0[%c0, %c0_0, %c0_1] : memref<2x24x32xf32, #tpu.memory_space<vmem>>, vector<1x24x32xf32>
    %1 = vector.shape_cast %0 : vector<1x24x32xf32> to vector<24x32xf32>
    %c0_2 = arith.constant 0 : index
    %c0_3 = arith.constant 0 : index
    %c0_4 = arith.constant 0 : index
    %2 = vector.load %arg1[%c0_2, %c0_3, %c0_4] : memref<2x24x24xf32, #tpu.memory_space<vmem>>, vector<1x24x24xf32>
    %3 = vector.shape_cast %2 : vector<1x24x24xf32> to vector<24x24xf32>
    %c0_5 = arith.constant 0 : index
    %c0_6 = arith.constant 0 : index
    %c0_7 = arith.constant 0 : index
    %4 = vector.load %arg2[%c0_5, %c0_6, %c0_7] : memref<2x2x24xf32, #tpu.memory_space<vmem>>, vector<1x2x24xf32>
    %5 = vector.shape_cast %4 : vector<1x2x24xf32> to vector<2x24xf32>
    %c0_8 = arith.constant 0 : index
    %c0_9 = arith.constant 0 : index
    %c0_10 = arith.constant 0 : index
    %6 = vector.load %arg3[%c0_8, %c0_9, %c0_10] : memref<2x32x96xbf16, #tpu.memory_space<vmem>>, vector<1x32x96xbf16>
    %7 = vector.shape_cast %6 : vector<1x32x96xbf16> to vector<32x96xbf16>
    %c0_11 = arith.constant 0 : index
    %c0_12 = arith.constant 0 : index
    %c0_13 = arith.constant 0 : index
    %8 = vector.load %arg4[%c0_11, %c0_12, %c0_13] : memref<2x32x32xbf16, #tpu.memory_space<vmem>>, vector<1x32x32xbf16>
    %9 = vector.shape_cast %8 : vector<1x32x32xbf16> to vector<32x32xbf16>
    %c0_14 = arith.constant 0 : index
    %c0_15 = arith.constant 0 : index
    %c0_16 = arith.constant 0 : index
    %10 = vector.load %arg5[%c0_14, %c0_15, %c0_16] : memref<2x32x64xbf16, #tpu.memory_space<vmem>>, vector<1x32x64xbf16>
    %11 = vector.shape_cast %10 : vector<1x32x64xbf16> to vector<32x64xbf16>
    %c0_17 = arith.constant 0 : index
    %c0_18 = arith.constant 0 : index
    %c0_19 = arith.constant 0 : index
    %12 = vector.load %arg6[%c0_17, %c0_18, %c0_19] : memref<2x64x32xbf16, #tpu.memory_space<vmem>>, vector<1x64x32xbf16>
    %13 = vector.shape_cast %12 : vector<1x64x32xbf16> to vector<64x32xbf16>
    %c0_20 = arith.constant 0 : index
    %c0_21 = arith.constant 0 : index
    %c0_22 = arith.constant 0 : index
    %14 = vector.load %arg7[%c0_20, %c0_21, %c0_22] : memref<2x6x64xf32, #tpu.memory_space<vmem>>, vector<1x6x64xf32>
    %15 = vector.shape_cast %14 : vector<1x6x64xf32> to vector<6x64xf32>
    %16 = vector.extract_strided_slice %15 {offsets = [0, 0], sizes = [1, 64], strides = [1, 1]} : vector<6x64xf32> to vector<1x64xf32>
    %17 = vector.extract_strided_slice %15 {offsets = [1, 0], sizes = [1, 32], strides = [1, 1]} : vector<6x64xf32> to vector<1x32xf32>
    %18 = vector.extract_strided_slice %15 {offsets = [2, 0], sizes = [1, 32], strides = [1, 1]} : vector<6x64xf32> to vector<1x32xf32>
    %19 = vector.extract_strided_slice %15 {offsets = [3, 0], sizes = [1, 32], strides = [1, 1]} : vector<6x64xf32> to vector<1x32xf32>
    %20 = vector.extract_strided_slice %15 {offsets = [4, 0], sizes = [1, 32], strides = [1, 1]} : vector<6x64xf32> to vector<1x32xf32>
    %21 = vector.extract_strided_slice %15 {offsets = [5, 0], sizes = [1, 32], strides = [1, 1]} : vector<6x64xf32> to vector<1x32xf32>
    %22 = arith.truncf %1 : vector<24x32xf32> to vector<24x32xbf16>
    %cst = arith.constant dense<0.000000e+00> : vector<24x96xf32>
    %23 = tpu.matmul %22, %7, %cst {dimension_numbers = #tpu.dot_dimension_numbers<[1], [0], [0], [1], [0, 0, 1, 1], [], []>} : vector<24x32xbf16>, vector<32x96xbf16>, vector<24x96xf32> -> vector<24x96xf32>
    %24 = vector.extract_strided_slice %23 {offsets = [0, 0], sizes = [24, 24], strides = [1, 1]} : vector<24x96xf32> to vector<24x24xf32>
    %25 = vector.shape_cast %24 : vector<24x24xf32> to vector<1x24x24xf32>
    %26 = vector.extract_strided_slice %23 {offsets = [0, 24], sizes = [24, 24], strides = [1, 1]} : vector<24x96xf32> to vector<24x24xf32>
    %27 = vector.shape_cast %26 : vector<24x24xf32> to vector<1x24x24xf32>
    %28 = vector.extract_strided_slice %23 {offsets = [0, 48], sizes = [24, 24], strides = [1, 1]} : vector<24x96xf32> to vector<24x24xf32>
    %29 = vector.shape_cast %28 : vector<24x24xf32> to vector<1x24x24xf32>
    %30 = vector.extract_strided_slice %23 {offsets = [0, 72], sizes = [24, 24], strides = [1, 1]} : vector<24x96xf32> to vector<24x24xf32>
    %31 = vector.shape_cast %30 : vector<24x24xf32> to vector<1x24x24xf32>
    %32 = tpu.concatenate %25, %27, %29, %31 in 0 : vector<1x24x24xf32>, vector<1x24x24xf32>, vector<1x24x24xf32>, vector<1x24x24xf32> -> vector<4x24x24xf32>
    %33 = vector.extract_strided_slice %32 {offsets = [0, 0, 0], sizes = [4, 24, 8], strides = [1, 1, 1]} : vector<4x24x24xf32> to vector<4x24x8xf32>
    %34 = arith.truncf %33 : vector<4x24x8xf32> to vector<4x24x8xbf16>
    %35 = vector.extract_strided_slice %32 {offsets = [0, 0, 8], sizes = [4, 24, 8], strides = [1, 1, 1]} : vector<4x24x24xf32> to vector<4x24x8xf32>
    %36 = arith.truncf %35 : vector<4x24x8xf32> to vector<4x24x8xbf16>
    %37 = vector.extract_strided_slice %32 {offsets = [0, 0, 16], sizes = [4, 24, 8], strides = [1, 1, 1]} : vector<4x24x24xf32> to vector<4x24x8xf32>
    %38 = arith.truncf %37 : vector<4x24x8xf32> to vector<4x24x8xbf16>
    "tpu.trace_start"() <{level = 10 : i32, message = "ntd,nsd->nts"}> : () -> ()
    %cst_23 = arith.constant dense<0.000000e+00> : vector<4x24x24xf32>
    %39 = tpu.matmul %34, %36, %cst_23 {dimension_numbers = #tpu.dot_dimension_numbers<[2], [2], [1], [1], [0, 0, 0, 1, 1, 1], [0], [0]>} : vector<4x24x8xbf16>, vector<4x24x8xbf16>, vector<4x24x24xf32> -> vector<4x24x24xf32>
    "tpu.trace_stop"() : () -> ()
    %40 = vector.shape_cast %3 : vector<24x24xf32> to vector<1x24x24xf32>
    %41 = vector.broadcast %40 : vector<1x24x24xf32> to vector<4x24x24xf32>
    %42 = arith.addf %39, %41 : vector<4x24x24xf32>
    %cst_24 = arith.constant dense<0xFF800000> : vector<4x24xf32>
    %43 = vector.multi_reduction <maximumf>, %42, %cst_24 [2] : vector<4x24x24xf32> to vector<4x24xf32>
    %44 = vector.shape_cast %43 : vector<4x24xf32> to vector<4x24x1xf32>
    %45 = vector.broadcast %44 : vector<4x24x1xf32> to vector<4x24x24xf32>
    %46 = arith.subf %42, %45 : vector<4x24x24xf32>
    %47 = math.exp %46 : vector<4x24x24xf32>
    %cst_25 = arith.constant dense<0.000000e+00> : vector<4x24xf32>
    %48 = vector.multi_reduction <add>, %47, %cst_25 [2] : vector<4x24x24xf32> to vector<4x24xf32>
    %49 = vector.shape_cast %48 : vector<4x24xf32> to vector<4x24x1xf32>
    %50 = tpu.reciprocal %49 {approx = true} : vector<4x24x1xf32> -> vector<4x24x1xf32>
    %51 = vector.broadcast %50 : vector<4x24x1xf32> to vector<4x24x24xf32>
    %52 = arith.mulf %47, %51 : vector<4x24x24xf32>
    %53 = arith.truncf %52 : vector<4x24x24xf32> to vector<4x24x24xbf16>
    "tpu.trace_start"() <{level = 10 : i32, message = "nts,nsd->ntd"}> : () -> ()
    %cst_26 = arith.constant dense<0.000000e+00> : vector<4x24x8xf32>
    %54 = tpu.matmul %53, %38, %cst_26 {dimension_numbers = #tpu.dot_dimension_numbers<[2], [1], [1], [2], [0, 0, 0, 1, 1, 2], [0], [0]>} : vector<4x24x24xbf16>, vector<4x24x8xbf16>, vector<4x24x8xf32> -> vector<4x24x8xf32>
    "tpu.trace_stop"() : () -> ()
    %55 = vector.extract_strided_slice %54 {offsets = [0, 0, 0], sizes = [1, 24, 8], strides = [1, 1, 1]} : vector<4x24x8xf32> to vector<1x24x8xf32>
    %56 = vector.shape_cast %55 : vector<1x24x8xf32> to vector<24x8xf32>
    %57 = vector.extract_strided_slice %54 {offsets = [1, 0, 0], sizes = [1, 24, 8], strides = [1, 1, 1]} : vector<4x24x8xf32> to vector<1x24x8xf32>
    %58 = vector.shape_cast %57 : vector<1x24x8xf32> to vector<24x8xf32>
    %59 = vector.extract_strided_slice %54 {offsets = [2, 0, 0], sizes = [1, 24, 8], strides = [1, 1, 1]} : vector<4x24x8xf32> to vector<1x24x8xf32>
    %60 = vector.shape_cast %59 : vector<1x24x8xf32> to vector<24x8xf32>
    %61 = vector.extract_strided_slice %54 {offsets = [3, 0, 0], sizes = [1, 24, 8], strides = [1, 1, 1]} : vector<4x24x8xf32> to vector<1x24x8xf32>
    %62 = vector.shape_cast %61 : vector<1x24x8xf32> to vector<24x8xf32>
    %63 = tpu.concatenate %56, %58, %60, %62 in 1 : vector<24x8xf32>, vector<24x8xf32>, vector<24x8xf32>, vector<24x8xf32> -> vector<24x32xf32>
    %64 = arith.truncf %63 : vector<24x32xf32> to vector<24x32xbf16>
    %cst_27 = arith.constant dense<0.000000e+00> : vector<24x32xf32>
    %65 = tpu.matmul %64, %9, %cst_27 {dimension_numbers = #tpu.dot_dimension_numbers<[1], [0], [0], [1], [0, 0, 1, 1], [], []>} : vector<24x32xbf16>, vector<32x32xbf16>, vector<24x32xf32> -> vector<24x32xf32>
    %66 = arith.addf %1, %65 : vector<24x32xf32>
    %cst_28 = arith.constant dense<0.000000e+00> : vector<24xf32>
    %67 = vector.multi_reduction <add>, %66, %cst_28 [1] : vector<24x32xf32> to vector<24xf32>
    %68 = vector.shape_cast %67 : vector<24xf32> to vector<24x1xf32>
    %cst_29 = arith.constant 3.200000e+01 : f32
    %69 = vector.broadcast %cst_29 : f32 to vector<24x1xf32>
    %70 = arith.divf %68, %69 : vector<24x1xf32>
    %71 = vector.broadcast %70 : vector<24x1xf32> to vector<24x32xf32>
    %72 = arith.subf %66, %71 : vector<24x32xf32>
    %73 = arith.mulf %72, %72 : vector<24x32xf32>
    %cst_30 = arith.constant dense<0.000000e+00> : vector<24xf32>
    %74 = vector.multi_reduction <add>, %73, %cst_30 [1] : vector<24x32xf32> to vector<24xf32>
    %75 = vector.shape_cast %74 : vector<24xf32> to vector<24x1xf32>
    %cst_31 = arith.constant 3.200000e+01 : f32
    %76 = vector.broadcast %cst_31 : f32 to vector<24x1xf32>
    %77 = arith.divf %75, %76 : vector<24x1xf32>
    %cst_32 = arith.constant 9.99999974E-6 : f32
    %78 = vector.broadcast %cst_32 : f32 to vector<24x1xf32>
    %79 = arith.addf %77, %78 : vector<24x1xf32>
    %80 = math.rsqrt %79 : vector<24x1xf32>
    %81 = vector.broadcast %80 : vector<24x1xf32> to vector<24x32xf32>
    %82 = arith.mulf %72, %81 : vector<24x32xf32>
    %83 = vector.broadcast %18 : vector<1x32xf32> to vector<24x32xf32>
    %84 = arith.mulf %82, %83 : vector<24x32xf32>
    %85 = vector.broadcast %19 : vector<1x32xf32> to vector<24x32xf32>
    %86 = arith.addf %84, %85 : vector<24x32xf32>
    %87 = arith.truncf %86 : vector<24x32xf32> to vector<24x32xbf16>
    %cst_33 = arith.constant dense<0.000000e+00> : vector<24x64xf32>
    %88 = tpu.matmul %87, %11, %cst_33 {dimension_numbers = #tpu.dot_dimension_numbers<[1], [0], [0], [1], [0, 0, 1, 1], [], []>} : vector<24x32xbf16>, vector<32x64xbf16>, vector<24x64xf32> -> vector<24x64xf32>
    %89 = vector.broadcast %16 : vector<1x64xf32> to vector<24x64xf32>
    %90 = arith.addf %88, %89 : vector<24x64xf32>
    %cst_34 = arith.constant 0.000000e+00 : f32
    %91 = vector.broadcast %cst_34 : f32 to vector<24x64xf32>
    %92 = arith.maximumf %90, %91 : vector<24x64xf32>
    %93 = arith.truncf %92 : vector<24x64xf32> to vector<24x64xbf16>
    %cst_35 = arith.constant dense<0.000000e+00> : vector<24x32xf32>
    %94 = tpu.matmul %93, %13, %cst_35 {dimension_numbers = #tpu.dot_dimension_numbers<[1], [0], [0], [1], [0, 0, 1, 1], [], []>} : vector<24x64xbf16>, vector<64x32xbf16>, vector<24x32xf32> -> vector<24x32xf32>
    %95 = vector.broadcast %17 : vector<1x32xf32> to vector<24x32xf32>
    %96 = arith.addf %94, %95 : vector<24x32xf32>
    %97 = arith.addf %86, %96 : vector<24x32xf32>
    %cst_36 = arith.constant dense<0.000000e+00> : vector<24xf32>
    %98 = vector.multi_reduction <add>, %97, %cst_36 [1] : vector<24x32xf32> to vector<24xf32>
    %99 = vector.shape_cast %98 : vector<24xf32> to vector<24x1xf32>
    %cst_37 = arith.constant 3.200000e+01 : f32
    %100 = vector.broadcast %cst_37 : f32 to vector<24x1xf32>
    %101 = arith.divf %99, %100 : vector<24x1xf32>
    %102 = vector.broadcast %101 : vector<24x1xf32> to vector<24x32xf32>
    %103 = arith.subf %97, %102 : vector<24x32xf32>
    %104 = arith.mulf %103, %103 : vector<24x32xf32>
    %cst_38 = arith.constant dense<0.000000e+00> : vector<24xf32>
    %105 = vector.multi_reduction <add>, %104, %cst_38 [1] : vector<24x32xf32> to vector<24xf32>
    %106 = vector.shape_cast %105 : vector<24xf32> to vector<24x1xf32>
    %cst_39 = arith.constant 3.200000e+01 : f32
    %107 = vector.broadcast %cst_39 : f32 to vector<24x1xf32>
    %108 = arith.divf %106, %107 : vector<24x1xf32>
    %cst_40 = arith.constant 9.99999974E-6 : f32
    %109 = vector.broadcast %cst_40 : f32 to vector<24x1xf32>
    %110 = arith.addf %108, %109 : vector<24x1xf32>
    %111 = math.rsqrt %110 : vector<24x1xf32>
    %112 = vector.broadcast %111 : vector<24x1xf32> to vector<24x32xf32>
    %113 = arith.mulf %103, %112 : vector<24x32xf32>
    %114 = vector.broadcast %20 : vector<1x32xf32> to vector<24x32xf32>
    %115 = arith.mulf %113, %114 : vector<24x32xf32>
    %116 = vector.broadcast %21 : vector<1x32xf32> to vector<24x32xf32>
    %117 = arith.addf %115, %116 : vector<24x32xf32>
    %cst_41 = arith.constant dense<0.000000e+00> : vector<2x32xf32>
    %118 = tpu.matmul %5, %117, %cst_41 {dimension_numbers = #tpu.dot_dimension_numbers<[1], [0], [0], [1], [0, 0, 1, 1], [], []>} : vector<2x24xf32>, vector<24x32xf32>, vector<2x32xf32> -> vector<2x32xf32>
    %cst_42 = arith.constant dense<0.000000e+00> : vector<2xf32>
    %119 = vector.multi_reduction <add>, %5, %cst_42 [1] : vector<2x24xf32> to vector<2xf32>
    %120 = vector.shape_cast %119 : vector<2xf32> to vector<2x1xf32>
    %cst_43 = arith.constant 1.000000e+00 : f32
    %121 = vector.broadcast %cst_43 : f32 to vector<2x1xf32>
    %122 = arith.maximumf %120, %121 : vector<2x1xf32>
    %123 = vector.broadcast %122 : vector<2x1xf32> to vector<2x32xf32>
    %124 = arith.divf %118, %123 : vector<2x32xf32>
    %c1 = arith.constant 1 : index
    %c0_44 = arith.constant 0 : index
    %c0_45 = arith.constant 0 : index
    %125 = vector.load %arg0[%c1, %c0_44, %c0_45] : memref<2x24x32xf32, #tpu.memory_space<vmem>>, vector<1x24x32xf32>
    %126 = vector.shape_cast %125 : vector<1x24x32xf32> to vector<24x32xf32>
    %c1_46 = arith.constant 1 : index
    %c0_47 = arith.constant 0 : index
    %c0_48 = arith.constant 0 : index
    %127 = vector.load %arg1[%c1_46, %c0_47, %c0_48] : memref<2x24x24xf32, #tpu.memory_space<vmem>>, vector<1x24x24xf32>
    %128 = vector.shape_cast %127 : vector<1x24x24xf32> to vector<24x24xf32>
    %c1_49 = arith.constant 1 : index
    %c0_50 = arith.constant 0 : index
    %c0_51 = arith.constant 0 : index
    %129 = vector.load %arg2[%c1_49, %c0_50, %c0_51] : memref<2x2x24xf32, #tpu.memory_space<vmem>>, vector<1x2x24xf32>
    %130 = vector.shape_cast %129 : vector<1x2x24xf32> to vector<2x24xf32>
    %c1_52 = arith.constant 1 : index
    %c0_53 = arith.constant 0 : index
    %c0_54 = arith.constant 0 : index
    %131 = vector.load %arg3[%c1_52, %c0_53, %c0_54] : memref<2x32x96xbf16, #tpu.memory_space<vmem>>, vector<1x32x96xbf16>
    %132 = vector.shape_cast %131 : vector<1x32x96xbf16> to vector<32x96xbf16>
    %c1_55 = arith.constant 1 : index
    %c0_56 = arith.constant 0 : index
    %c0_57 = arith.constant 0 : index
    %133 = vector.load %arg4[%c1_55, %c0_56, %c0_57] : memref<2x32x32xbf16, #tpu.memory_space<vmem>>, vector<1x32x32xbf16>
    %134 = vector.shape_cast %133 : vector<1x32x32xbf16> to vector<32x32xbf16>
    %c1_58 = arith.constant 1 : index
    %c0_59 = arith.constant 0 : index
    %c0_60 = arith.constant 0 : index
    %135 = vector.load %arg5[%c1_58, %c0_59, %c0_60] : memref<2x32x64xbf16, #tpu.memory_space<vmem>>, vector<1x32x64xbf16>
    %136 = vector.shape_cast %135 : vector<1x32x64xbf16> to vector<32x64xbf16>
    %c1_61 = arith.constant 1 : index
    %c0_62 = arith.constant 0 : index
    %c0_63 = arith.constant 0 : index
    %137 = vector.load %arg6[%c1_61, %c0_62, %c0_63] : memref<2x64x32xbf16, #tpu.memory_space<vmem>>, vector<1x64x32xbf16>
    %138 = vector.shape_cast %137 : vector<1x64x32xbf16> to vector<64x32xbf16>
    %c1_64 = arith.constant 1 : index
    %c0_65 = arith.constant 0 : index
    %c0_66 = arith.constant 0 : index
    %139 = vector.load %arg7[%c1_64, %c0_65, %c0_66] : memref<2x6x64xf32, #tpu.memory_space<vmem>>, vector<1x6x64xf32>
    %140 = vector.shape_cast %139 : vector<1x6x64xf32> to vector<6x64xf32>
    %141 = vector.extract_strided_slice %140 {offsets = [0, 0], sizes = [1, 64], strides = [1, 1]} : vector<6x64xf32> to vector<1x64xf32>
    %142 = vector.extract_strided_slice %140 {offsets = [1, 0], sizes = [1, 32], strides = [1, 1]} : vector<6x64xf32> to vector<1x32xf32>
    %143 = vector.extract_strided_slice %140 {offsets = [2, 0], sizes = [1, 32], strides = [1, 1]} : vector<6x64xf32> to vector<1x32xf32>
    %144 = vector.extract_strided_slice %140 {offsets = [3, 0], sizes = [1, 32], strides = [1, 1]} : vector<6x64xf32> to vector<1x32xf32>
    %145 = vector.extract_strided_slice %140 {offsets = [4, 0], sizes = [1, 32], strides = [1, 1]} : vector<6x64xf32> to vector<1x32xf32>
    %146 = vector.extract_strided_slice %140 {offsets = [5, 0], sizes = [1, 32], strides = [1, 1]} : vector<6x64xf32> to vector<1x32xf32>
    %147 = arith.truncf %126 : vector<24x32xf32> to vector<24x32xbf16>
    %cst_67 = arith.constant dense<0.000000e+00> : vector<24x96xf32>
    %148 = tpu.matmul %147, %132, %cst_67 {dimension_numbers = #tpu.dot_dimension_numbers<[1], [0], [0], [1], [0, 0, 1, 1], [], []>} : vector<24x32xbf16>, vector<32x96xbf16>, vector<24x96xf32> -> vector<24x96xf32>
    %149 = vector.extract_strided_slice %148 {offsets = [0, 0], sizes = [24, 24], strides = [1, 1]} : vector<24x96xf32> to vector<24x24xf32>
    %150 = vector.shape_cast %149 : vector<24x24xf32> to vector<1x24x24xf32>
    %151 = vector.extract_strided_slice %148 {offsets = [0, 24], sizes = [24, 24], strides = [1, 1]} : vector<24x96xf32> to vector<24x24xf32>
    %152 = vector.shape_cast %151 : vector<24x24xf32> to vector<1x24x24xf32>
    %153 = vector.extract_strided_slice %148 {offsets = [0, 48], sizes = [24, 24], strides = [1, 1]} : vector<24x96xf32> to vector<24x24xf32>
    %154 = vector.shape_cast %153 : vector<24x24xf32> to vector<1x24x24xf32>
    %155 = vector.extract_strided_slice %148 {offsets = [0, 72], sizes = [24, 24], strides = [1, 1]} : vector<24x96xf32> to vector<24x24xf32>
    %156 = vector.shape_cast %155 : vector<24x24xf32> to vector<1x24x24xf32>
    %157 = tpu.concatenate %150, %152, %154, %156 in 0 : vector<1x24x24xf32>, vector<1x24x24xf32>, vector<1x24x24xf32>, vector<1x24x24xf32> -> vector<4x24x24xf32>
    %158 = vector.extract_strided_slice %157 {offsets = [0, 0, 0], sizes = [4, 24, 8], strides = [1, 1, 1]} : vector<4x24x24xf32> to vector<4x24x8xf32>
    %159 = arith.truncf %158 : vector<4x24x8xf32> to vector<4x24x8xbf16>
    %160 = vector.extract_strided_slice %157 {offsets = [0, 0, 8], sizes = [4, 24, 8], strides = [1, 1, 1]} : vector<4x24x24xf32> to vector<4x24x8xf32>
    %161 = arith.truncf %160 : vector<4x24x8xf32> to vector<4x24x8xbf16>
    %162 = vector.extract_strided_slice %157 {offsets = [0, 0, 16], sizes = [4, 24, 8], strides = [1, 1, 1]} : vector<4x24x24xf32> to vector<4x24x8xf32>
    %163 = arith.truncf %162 : vector<4x24x8xf32> to vector<4x24x8xbf16>
    "tpu.trace_start"() <{level = 10 : i32, message = "ntd,nsd->nts"}> : () -> ()
    %cst_68 = arith.constant dense<0.000000e+00> : vector<4x24x24xf32>
    %164 = tpu.matmul %159, %161, %cst_68 {dimension_numbers = #tpu.dot_dimension_numbers<[2], [2], [1], [1], [0, 0, 0, 1, 1, 1], [0], [0]>} : vector<4x24x8xbf16>, vector<4x24x8xbf16>, vector<4x24x24xf32> -> vector<4x24x24xf32>
    "tpu.trace_stop"() : () -> ()
    %165 = vector.shape_cast %128 : vector<24x24xf32> to vector<1x24x24xf32>
    %166 = vector.broadcast %165 : vector<1x24x24xf32> to vector<4x24x24xf32>
    %167 = arith.addf %164, %166 : vector<4x24x24xf32>
    %cst_69 = arith.constant dense<0xFF800000> : vector<4x24xf32>
    %168 = vector.multi_reduction <maximumf>, %167, %cst_69 [2] : vector<4x24x24xf32> to vector<4x24xf32>
    %169 = vector.shape_cast %168 : vector<4x24xf32> to vector<4x24x1xf32>
    %170 = vector.broadcast %169 : vector<4x24x1xf32> to vector<4x24x24xf32>
    %171 = arith.subf %167, %170 : vector<4x24x24xf32>
    %172 = math.exp %171 : vector<4x24x24xf32>
    %cst_70 = arith.constant dense<0.000000e+00> : vector<4x24xf32>
    %173 = vector.multi_reduction <add>, %172, %cst_70 [2] : vector<4x24x24xf32> to vector<4x24xf32>
    %174 = vector.shape_cast %173 : vector<4x24xf32> to vector<4x24x1xf32>
    %175 = tpu.reciprocal %174 {approx = true} : vector<4x24x1xf32> -> vector<4x24x1xf32>
    %176 = vector.broadcast %175 : vector<4x24x1xf32> to vector<4x24x24xf32>
    %177 = arith.mulf %172, %176 : vector<4x24x24xf32>
    %178 = arith.truncf %177 : vector<4x24x24xf32> to vector<4x24x24xbf16>
    "tpu.trace_start"() <{level = 10 : i32, message = "nts,nsd->ntd"}> : () -> ()
    %cst_71 = arith.constant dense<0.000000e+00> : vector<4x24x8xf32>
    %179 = tpu.matmul %178, %163, %cst_71 {dimension_numbers = #tpu.dot_dimension_numbers<[2], [1], [1], [2], [0, 0, 0, 1, 1, 2], [0], [0]>} : vector<4x24x24xbf16>, vector<4x24x8xbf16>, vector<4x24x8xf32> -> vector<4x24x8xf32>
    "tpu.trace_stop"() : () -> ()
    %180 = vector.extract_strided_slice %179 {offsets = [0, 0, 0], sizes = [1, 24, 8], strides = [1, 1, 1]} : vector<4x24x8xf32> to vector<1x24x8xf32>
    %181 = vector.shape_cast %180 : vector<1x24x8xf32> to vector<24x8xf32>
    %182 = vector.extract_strided_slice %179 {offsets = [1, 0, 0], sizes = [1, 24, 8], strides = [1, 1, 1]} : vector<4x24x8xf32> to vector<1x24x8xf32>
    %183 = vector.shape_cast %182 : vector<1x24x8xf32> to vector<24x8xf32>
    %184 = vector.extract_strided_slice %179 {offsets = [2, 0, 0], sizes = [1, 24, 8], strides = [1, 1, 1]} : vector<4x24x8xf32> to vector<1x24x8xf32>
    %185 = vector.shape_cast %184 : vector<1x24x8xf32> to vector<24x8xf32>
    %186 = vector.extract_strided_slice %179 {offsets = [3, 0, 0], sizes = [1, 24, 8], strides = [1, 1, 1]} : vector<4x24x8xf32> to vector<1x24x8xf32>
    %187 = vector.shape_cast %186 : vector<1x24x8xf32> to vector<24x8xf32>
    %188 = tpu.concatenate %181, %183, %185, %187 in 1 : vector<24x8xf32>, vector<24x8xf32>, vector<24x8xf32>, vector<24x8xf32> -> vector<24x32xf32>
    %189 = arith.truncf %188 : vector<24x32xf32> to vector<24x32xbf16>
    %cst_72 = arith.constant dense<0.000000e+00> : vector<24x32xf32>
    %190 = tpu.matmul %189, %134, %cst_72 {dimension_numbers = #tpu.dot_dimension_numbers<[1], [0], [0], [1], [0, 0, 1, 1], [], []>} : vector<24x32xbf16>, vector<32x32xbf16>, vector<24x32xf32> -> vector<24x32xf32>
    %191 = arith.addf %126, %190 : vector<24x32xf32>
    %cst_73 = arith.constant dense<0.000000e+00> : vector<24xf32>
    %192 = vector.multi_reduction <add>, %191, %cst_73 [1] : vector<24x32xf32> to vector<24xf32>
    %193 = vector.shape_cast %192 : vector<24xf32> to vector<24x1xf32>
    %cst_74 = arith.constant 3.200000e+01 : f32
    %194 = vector.broadcast %cst_74 : f32 to vector<24x1xf32>
    %195 = arith.divf %193, %194 : vector<24x1xf32>
    %196 = vector.broadcast %195 : vector<24x1xf32> to vector<24x32xf32>
    %197 = arith.subf %191, %196 : vector<24x32xf32>
    %198 = arith.mulf %197, %197 : vector<24x32xf32>
    %cst_75 = arith.constant dense<0.000000e+00> : vector<24xf32>
    %199 = vector.multi_reduction <add>, %198, %cst_75 [1] : vector<24x32xf32> to vector<24xf32>
    %200 = vector.shape_cast %199 : vector<24xf32> to vector<24x1xf32>
    %cst_76 = arith.constant 3.200000e+01 : f32
    %201 = vector.broadcast %cst_76 : f32 to vector<24x1xf32>
    %202 = arith.divf %200, %201 : vector<24x1xf32>
    %cst_77 = arith.constant 9.99999974E-6 : f32
    %203 = vector.broadcast %cst_77 : f32 to vector<24x1xf32>
    %204 = arith.addf %202, %203 : vector<24x1xf32>
    %205 = math.rsqrt %204 : vector<24x1xf32>
    %206 = vector.broadcast %205 : vector<24x1xf32> to vector<24x32xf32>
    %207 = arith.mulf %197, %206 : vector<24x32xf32>
    %208 = vector.broadcast %143 : vector<1x32xf32> to vector<24x32xf32>
    %209 = arith.mulf %207, %208 : vector<24x32xf32>
    %210 = vector.broadcast %144 : vector<1x32xf32> to vector<24x32xf32>
    %211 = arith.addf %209, %210 : vector<24x32xf32>
    %212 = arith.truncf %211 : vector<24x32xf32> to vector<24x32xbf16>
    %cst_78 = arith.constant dense<0.000000e+00> : vector<24x64xf32>
    %213 = tpu.matmul %212, %136, %cst_78 {dimension_numbers = #tpu.dot_dimension_numbers<[1], [0], [0], [1], [0, 0, 1, 1], [], []>} : vector<24x32xbf16>, vector<32x64xbf16>, vector<24x64xf32> -> vector<24x64xf32>
    %214 = vector.broadcast %141 : vector<1x64xf32> to vector<24x64xf32>
    %215 = arith.addf %213, %214 : vector<24x64xf32>
    %cst_79 = arith.constant 0.000000e+00 : f32
    %216 = vector.broadcast %cst_79 : f32 to vector<24x64xf32>
    %217 = arith.maximumf %215, %216 : vector<24x64xf32>
    %218 = arith.truncf %217 : vector<24x64xf32> to vector<24x64xbf16>
    %cst_80 = arith.constant dense<0.000000e+00> : vector<24x32xf32>
    %219 = tpu.matmul %218, %138, %cst_80 {dimension_numbers = #tpu.dot_dimension_numbers<[1], [0], [0], [1], [0, 0, 1, 1], [], []>} : vector<24x64xbf16>, vector<64x32xbf16>, vector<24x32xf32> -> vector<24x32xf32>
    %220 = vector.broadcast %142 : vector<1x32xf32> to vector<24x32xf32>
    %221 = arith.addf %219, %220 : vector<24x32xf32>
    %222 = arith.addf %211, %221 : vector<24x32xf32>
    %cst_81 = arith.constant dense<0.000000e+00> : vector<24xf32>
    %223 = vector.multi_reduction <add>, %222, %cst_81 [1] : vector<24x32xf32> to vector<24xf32>
    %224 = vector.shape_cast %223 : vector<24xf32> to vector<24x1xf32>
    %cst_82 = arith.constant 3.200000e+01 : f32
    %225 = vector.broadcast %cst_82 : f32 to vector<24x1xf32>
    %226 = arith.divf %224, %225 : vector<24x1xf32>
    %227 = vector.broadcast %226 : vector<24x1xf32> to vector<24x32xf32>
    %228 = arith.subf %222, %227 : vector<24x32xf32>
    %229 = arith.mulf %228, %228 : vector<24x32xf32>
    %cst_83 = arith.constant dense<0.000000e+00> : vector<24xf32>
    %230 = vector.multi_reduction <add>, %229, %cst_83 [1] : vector<24x32xf32> to vector<24xf32>
    %231 = vector.shape_cast %230 : vector<24xf32> to vector<24x1xf32>
    %cst_84 = arith.constant 3.200000e+01 : f32
    %232 = vector.broadcast %cst_84 : f32 to vector<24x1xf32>
    %233 = arith.divf %231, %232 : vector<24x1xf32>
    %cst_85 = arith.constant 9.99999974E-6 : f32
    %234 = vector.broadcast %cst_85 : f32 to vector<24x1xf32>
    %235 = arith.addf %233, %234 : vector<24x1xf32>
    %236 = math.rsqrt %235 : vector<24x1xf32>
    %237 = vector.broadcast %236 : vector<24x1xf32> to vector<24x32xf32>
    %238 = arith.mulf %228, %237 : vector<24x32xf32>
    %239 = vector.broadcast %145 : vector<1x32xf32> to vector<24x32xf32>
    %240 = arith.mulf %238, %239 : vector<24x32xf32>
    %241 = vector.broadcast %146 : vector<1x32xf32> to vector<24x32xf32>
    %242 = arith.addf %240, %241 : vector<24x32xf32>
    %cst_86 = arith.constant dense<0.000000e+00> : vector<2x32xf32>
    %243 = tpu.matmul %130, %242, %cst_86 {dimension_numbers = #tpu.dot_dimension_numbers<[1], [0], [0], [1], [0, 0, 1, 1], [], []>} : vector<2x24xf32>, vector<24x32xf32>, vector<2x32xf32> -> vector<2x32xf32>
    %cst_87 = arith.constant dense<0.000000e+00> : vector<2xf32>
    %244 = vector.multi_reduction <add>, %130, %cst_87 [1] : vector<2x24xf32> to vector<2xf32>
    %245 = vector.shape_cast %244 : vector<2xf32> to vector<2x1xf32>
    %cst_88 = arith.constant 1.000000e+00 : f32
    %246 = vector.broadcast %cst_88 : f32 to vector<2x1xf32>
    %247 = arith.maximumf %245, %246 : vector<2x1xf32>
    %248 = vector.broadcast %247 : vector<2x1xf32> to vector<2x32xf32>
    %249 = arith.divf %243, %248 : vector<2x32xf32>
    %250 = vector.shape_cast %124 : vector<2x32xf32> to vector<1x2x32xf32>
    %251 = vector.shape_cast %249 : vector<2x32xf32> to vector<1x2x32xf32>
    %252 = tpu.concatenate %250, %251 in 0 : vector<1x2x32xf32>, vector<1x2x32xf32> -> vector<2x2x32xf32>
    %c0_89 = arith.constant 0 : index
    %c0_90 = arith.constant 0 : index
    %c0_91 = arith.constant 0 : index
    %253 = vector.load %arg8[%c0_89, %c0_90, %c0_91] : memref<2x2x32xf32, #tpu.memory_space<vmem>>, vector<2x2x32xf32>
    tpu.vector_store %arg8[%c0_89, %c0_90, %c0_91], %252 {strides = array<i32>} : memref<2x2x32xf32, #tpu.memory_space<vmem>>, vector<2x2x32xf32>,
    return
  }
}

</mosaic_0001>

<bundles_post_ra>
// kernel: tpu_custom_call.1
= control target key start
LH: loop header
LB: loop body
LE: loop exit
PB: predicated region body
PF: predicated region fallthrough
CT: control target
= control target key end

     0   :  { %13 = vsyncpa [#allocation3], 0  ;;  %s4165_s0 = inlined_call_operand.vmem [shape: f32[2,24,32], index: 0, kind: input, shape index: {}]   ;;  %s4166_s1 = inlined_call_operand.vmem [shape: f32[2,24,24], index: 1, kind: input, shape index: {}]   ;;  %s4167_s2 = inlined_call_operand.vmem [shape: f32[2,2,24], index: 2, kind: input, shape index: {}]   ;;  %s4168_s3 = inlined_call_operand.hbm [shape: bf16[2,32,96], index: 3, kind: input, shape index: {}]   ;;  %s4169_s4 = inlined_call_operand.hbm [shape: bf16[2,32,32], index: 4, kind: input, shape index: {}]   ;;  %s4170_s5 = inlined_call_operand.hbm [shape: bf16[2,32,64], index: 5, kind: input, shape index: {}]   ;;  %s4171_s6 = inlined_call_operand.vmem [shape: bf16[2,64,32], index: 6, kind: input, shape index: {}]   ;;  %s4172_s7 = inlined_call_operand.vmem [shape: f32[2,6,64], index: 7, kind: input, shape index: {}]   ;;  %s4173_s8 = inlined_call_operand.hbm [shape: f32[2,2,32], index: 8, kind: output, shape index: {}]  }
   0x1   :  { %14 = vsyncpa [#allocation6], 0 }
   0x2   :  { %15 = vsyncpa [#allocation4], 0  ;;  %s3367_s27 = smov [#allocation5]   ;;  %s3368_s29 = smov [#allocation2]  }
   0x3   :  { %s39_s28 = sshll.u32 %s3367_s27, 4  ;;  %s27_s30 = sshll.u32 %s3368_s29, 4  ;;  %s40_s28 = int_to_ptr.vmem [resolvable:$true] %s39_s28  ;;  %s3431_s30 = int_to_ptr.vmem [resolvable:$true] %s27_s30 }
   0x4   :  { %s3273_s11 = scalar_lea.hbm %s4169_s4, 512 }
   0x5   :  { %p3274_p0 = scmp.ne.s32.totalorder %s4169_s4, %s3273_s11  ;;  %p3277_p1 = scmp.lt.u32.totalorder %s3273_s11, %s4169_s4 }
   0x7   :  { %p3279_p2 = pnand %p3277_p1, %p3274_p0 }
   0x9   :  { %3282 = shalt.err (!%p3279_p2)
}
   0xa   :  { %s3283_s16 = scalar_lea.vmem %s40_s28, 512  ;;  %p3288_p4 = scmp.lt.s32.totalorder %s40_s28, %s40_s28 }
   0xb   :  { %p3284_p3 = scmp.ne.s32.totalorder %s40_s28, %s3283_s16  ;;  %p3289_p5 = scmp.lt.s32.totalorder %s3283_s16, %s3283_s16 }
   0xd   :  { %p3290_p6 = por %p3289_p5, %p3288_p4 }
   0xf   :  { %p3291_p7 = pnand %p3290_p6, %p3284_p3 }
  0x11   :  { %3294 = shalt.err (!%p3291_p7)
}
  0x12   :  { %s3369_s17 = smov 64   ;;  %s3370_s18 = smov 4  }
  0x13   :  { %45 = dma.hbm_to_vmem [thread:$0]  %s4169_s4, 512, %s40_s28, [#allocation6], %s3369_s17, %s3369_s17, %s3370_s18  }
  0x14   :  { %s3295_s23 = scalar_lea.hbm %s4168_s3, 512 }
  0x15   :  { %p3296_p8 = scmp.ne.s32.totalorder %s4168_s3, %s3295_s23  ;;  %p3299_p9 = scmp.lt.u32.totalorder %s3295_s23, %s4168_s3 }
  0x17   :  { %p3301_p10 = pnand %p3299_p9, %p3296_p8 }
  0x19   :  { %3304 = shalt.err (!%p3301_p10)
}
  0x1a   :  { %s3305_s29 = scalar_lea.vmem %s3431_s30, 512  ;;  %p3310_p12 = scmp.lt.s32.totalorder %s3431_s30, %s3431_s30 }
  0x1b   :  { %p3306_p11 = scmp.ne.s32.totalorder %s3431_s30, %s3305_s29  ;;  %p3311_p13 = scmp.lt.s32.totalorder %s3305_s29, %s3305_s29 }
  0x1d   :  { %p3312_p0 = por %p3311_p13, %p3310_p12 }
  0x1f   :  { %p3313_p1 = pnand %p3312_p0, %p3306_p11 }
  0x21   :  { %3316 = shalt.err (!%p3313_p1)
}
  0x22   :  { %33 = dma.hbm_to_vmem [thread:$0]  %s4168_s3, 512, %s3431_s30, [#allocation3], %s3369_s17, %s3369_s17, %s3370_s18  }
  0x23   :  { %s3371_s9 = smov [#allocation7]   ;;  %s3317_s13 = scalar_lea.hbm %s4170_s5, 512 }
  0x24   :  { %s51_s10 = sshll.u32 %s3371_s9, 4  ;;  %p3318_p2 = scmp.ne.s32.totalorder %s4170_s5, %s3317_s13  ;;  %s52_s10 = int_to_ptr.vmem [resolvable:$true] %s51_s10 }
  0x25   :  { %p3321_p3 = scmp.lt.u32.totalorder %s3317_s13, %s4170_s5 }
  0x27   :  { %p3323_p4 = pnand %p3321_p3, %p3318_p2 }
  0x29   :  { %3326 = shalt.err (!%p3323_p4)
}
  0x2a   :  { %s3327_s20 = scalar_lea.vmem %s52_s10, 512  ;;  %p3332_p6 = scmp.lt.s32.totalorder %s52_s10, %s52_s10 }
  0x2b   :  { %p3328_p5 = scmp.ne.s32.totalorder %s52_s10, %s3327_s20  ;;  %p3333_p7 = scmp.lt.s32.totalorder %s3327_s20, %s3327_s20 }
  0x2d   :  { %p3334_p8 = por %p3333_p7, %p3332_p6 }
  0x2f   :  { %p3335_p9 = pnand %p3334_p8, %p3328_p5 }
  0x31   :  { %3338 = shalt.err (!%p3335_p9)
}
  0x32   :  { %57 = dma.hbm_to_vmem [thread:$0]  %s4170_s5, 512, %s52_s10, [#allocation6], %s3369_s17, %s3369_s17, %s3370_s18  }
  0x33   :  { %3361 = dma.done.wait [#allocation3], 512  }
  0x34   :  { %3362 = vsyncadd [#allocation3], 4294966784 }
  0x35   :  { %3363 = dma.done.wait [#allocation6], 1024  }
  0x36   :  { %3364 = vsyncadd [#allocation6], 4294966272  ;;  %v3128_v0 = vld [vmem:[#allocation2] sm:$0xff]   ;;  %v3129_v1 = vld [vmem:[#allocation2 + $0x8] sm:$0xff]   ;;  %vm114_vm0 = vcmask 261120   ;;  %vm213_vm1 = vcmask 64512  }
  0x37   :  { %2801 = vmatprep.subr.bf16.mxu0 %v3128_v0  ;;  %v3486_v2 = vld [vmem:[%s4165_s0] sm:$0xff]  ;;  %v3491_v3 = vld [vmem:[%s4165_s0 + $0x8] sm:$0xff]  ;;  %v3496_v4 = vld [vmem:[%s4165_s0 + $0x10] sm:$0xff]  ;;  %s3372_s17 = smov 80   ;;  %s3373_s18 = smov 104   ;;  %vm472_vm2 = vcmask 195584  }
  0x38   :  { %2802 = vmatpush3.bf16.msra.mxu0 %v3128_v0  ;;  %v100_v5 = vpack.c.bf16 %v3491_v3, %v3486_v2  ;;  %v101_v6 = vpack.c.bf16 %v3496_v4, %v3496_v4  ;;  %s3374_s26 = smov 56   ;;  %s3375_s27 = smov 120   ;;  %v77_v48 = vld [vmem:[%s4166_s1 + $0x10] sm:$0xff]  ;;  %v75_v50 = vld [vmem:[%s4166_s1] sm:$0xff]  ;;  %v76_v53 = vld [vmem:[%s4166_s1 + $0x8] sm:$0xff]  ;;  %vm624_vm3 = vcmask 1043456  }
  0x39   :  { %2803 = vmatprep.subr.bf16.mxu0 %v3129_v1  ;;  %s3376_s12 = smov 112   ;;  %s3377_s13 = smov 8   ;;  %vm901_vm4 = vcmask 130048   ;;  %vm1138_vm5 = vcmask 523264   ;;  %vm3381_vm6 = vmmov 0   ;;  %vm1322_vm7 = vcmask 189440  }
  0x3a   :  { %2805 = vmatprep.mubr.msk.bf16.mxu0 %vm114_vm0, %v100_v5  ;;  %s3378_s14 = smov 16   ;;  %s3379_s15 = smov 24   ;;  %vm2586_vm8 = vcmask 254976  }
  0x3c   :  { %2804 = vmatpush3.bf16.msra.mxu0 %v3129_v1 }
  0x3f   :  { %2806 = vmatmul.mubr.msk.bf16.vlgmr.msra.gmra.mrb[0].mxu0 %vm114_vm0, %v101_v6 }
 0x112   :  { %v2807_v7 = vpop.f32.mrb[0].mxu0 }
 0x113   :  { %v155_v8 = vpop.f32.mrb[1].mxu0  ;;  %v3516_v13 = vpack.c.bf16 %v2807_v7, %v2807_v7 }
 0x114   :  { %v2808_v9 = vpop.f32.mrb[2].mxu0 }
 0x115   :  { %v158_v10 = vpop.f32.mrb[3].mxu0 }
 0x116   :  { %v3073_v11 = vpack.i.bf16 %v158_v10, %v155_v8  ;;  %v3504_v12 = vpack.c.bf16 %v158_v10, %v155_v8 }
 0x118   :  { %3074 = vrot.lane.b32.xlu1 %v3073_v11, %s3372_s17  ;;  %3069 = vrot.lane.b32.xlu0 %v3073_v11, %s3373_s18 }
 0x119   :  { %2813 = vmatprep.mubr.msk.bf16.mxu1 %vm213_vm1, %v3504_v12 }
 0x11c   :  { %3079 = vrot.lane.b32.xlu1 %v3073_v11, %s3374_s26  ;;  %176 = vrot.lane.b32.xlu0 %v2807_v7, %s3373_s18 }
 0x120   :  { %194 = vrot.lane.b32.xlu1 %v2807_v7, %s3374_s26  ;;  %185 = vrot.lane.b32.xlu0 %v2807_v7, %s3372_s17 }
 0x124   :  { %209 = vrot.lane.b32.xlu0 %v3504_v12, %s3375_s27 }
 0x128   :  { %211 = vrot.lane.b32.xlu0 %v3516_v13, %s3375_s27 }
 0x18a   :  { %v3075_v14 = vpop.permute.xlu1 %3074  ;;  %v3070_v15 = vpop.permute.xlu0 %3069 }
 0x18b   :  { %v3077_v16 = vunpack.i.h.bf16 %v3075_v14  ;;  %v3076_v17 = vunpack.i.l.bf16 %v3075_v14  ;;  %v3072_v18 = vunpack.i.h.bf16 %v3070_v15  ;;  %v3071_v19 = vunpack.i.l.bf16 %v3070_v15 }
 0x18d   :  { %v3520_v20 = vpack.c.bf16 %v3072_v18, %v3071_v19  ;;  %v3522_v21 = vpack.c.bf16 %v3077_v16, %v3076_v17 }
 0x18e   :  { %v3080_v22 = vpop.permute.xlu1 %3079  ;;  %v177_v23 = vpop.permute.xlu0 %176 }
 0x18f   :  { %276 = vrot.lane.b32.xlu1 %v3520_v20, %s3375_s27  ;;  %2821 = vmatprep.mubr.msk.bf16.mxu0 %vm213_vm1, %v3520_v20  ;;  %v3082_v24 = vunpack.i.h.bf16 %v3080_v22  ;;  %v3081_v25 = vunpack.i.l.bf16 %v3080_v22  ;;  %v3530_v26 = vpack.c.bf16 %v177_v23, %v177_v23 }
 0x190   :  { %342 = vrot.lane.b32.xlu0 %v3522_v21, %s3375_s27 }
 0x191   :  { %v3538_v29 = vpack.c.bf16 %v3082_v24, %v3081_v25 }
 0x192   :  { %v186_v27 = vpop.permute.xlu0 %185  ;;  %v195_v30 = vpop.permute.xlu1 %194 }
 0x193   :  { %v3532_v28 = vpack.c.bf16 %v186_v27, %v186_v27  ;;  %278 = vrot.lane.b32.xlu1 %v3530_v26, %s3375_s27  ;;  %v3544_v33 = vpack.c.bf16 %v195_v30, %v195_v30 }
 0x195   :  { %344 = vrot.lane.b32.xlu0 %v3532_v28, %s3375_s27 }
 0x196   :  { %v210_v31 = vpop.permute.xlu0 %209 }
 0x197   :  { %408 = vrot.lane.b32.xlu1 %v3538_v29, %s3375_s27  ;;  %3025 = vmatprep.subr.msk.bf16.mxu1 %vm213_vm1, %v210_v31  ;;  %v221_v32 = vsel %vm213_vm1, %v210_v31, 0 }
 0x198   :  { %2810 = vmatpush3.bf16.xpose.msra.mxu1 %v221_v32 }
 0x19a   :  { %v212_v34 = vpop.permute.xlu0 %211 }
 0x19b   :  { %410 = vrot.lane.b32.xlu1 %v3544_v33, %s3375_s27  ;;  %3026 = vmatprep.subr.msk.bf16.mxu1 %vm213_vm1, %v212_v34  ;;  %v224_v35 = vsel %vm213_vm1, %v212_v34, 0 }
 0x1a0   :  { %2812 = vmatpush3.bf16.xpose.msra.mxu1 %v224_v35 }
 0x1a7   :  { %2814 = vmatmul.mubr.msk.bf16.vlgmr.msra.gmra.mrb[0].mxu1 %vm213_vm1, %v3516_v13 }
 0x1a8   :  { %2829 = vmatprep.mubr.msk.bf16.mxu1 %vm213_vm1, %v3522_v21 }
 0x201   :  { %v277_v36 = vpop.permute.xlu1 %276 }
 0x202   :  { %v343_v37 = vpop.permute.xlu0 %342  ;;  %3027 = vmatprep.subr.msk.bf16.mxu0 %vm213_vm1, %v277_v36  ;;  %v287_v38 = vsel %vm213_vm1, %v277_v36, 0 }
 0x203   :  { %3029 = vmatprep.subr.msk.bf16.mxu1 %vm213_vm1, %v343_v37  ;;  %2818 = vmatpush3.bf16.xpose.msra.mxu0 %v287_v38  ;;  %v353_v39 = vsel %vm213_vm1, %v343_v37, 0 }
 0x204   :  { %2826 = vmatpush3.bf16.xpose.msra.mxu1 %v353_v39 }
 0x205   :  { %v279_v40 = vpop.permute.xlu1 %278 }
 0x206   :  { %3028 = vmatprep.subr.msk.bf16.mxu0 %vm213_vm1, %v279_v40  ;;  %v290_v42 = vsel %vm213_vm1, %v279_v40, 0 }
 0x207   :  { %v345_v41 = vpop.permute.xlu0 %344 }
 0x208   :  { %3030 = vmatprep.subr.msk.bf16.mxu1 %vm213_vm1, %v345_v41  ;;  %v356_v44 = vsel %vm213_vm1, %v345_v41, 0 }
 0x209   :  { %v409_v43 = vpop.permute.xlu1 %408 }
 0x20a   :  { %v419_v45 = vsel %vm213_vm1, %v409_v43, 0 }
 0x20b   :  { %2820 = vmatpush3.bf16.xpose.msra.mxu0 %v290_v42 }
 0x20c   :  { %2828 = vmatpush3.bf16.xpose.msra.mxu1 %v356_v44  ;;  %3031 = vmatprep.subr.msk.bf16.mxu0 %vm213_vm1, %v409_v43 }
 0x20d   :  { %v411_v46 = vpop.permute.xlu1 %410 }
 0x20e   :  { %v422_v47 = vsel %vm213_vm1, %v411_v46, 0 }
 0x212   :  { %2822 = vmatmul.mubr.msk.bf16.vlgmr.msra.gmra.mrb[4].mxu0 %vm213_vm1, %v3530_v26 }
 0x213   :  { %2830 = vmatmul.mubr.msk.bf16.vlgmr.msra.gmra.mrb[4].mxu1 %vm213_vm1, %v3532_v28  ;;  %2834 = vmatpush3.bf16.xpose.msra.mxu0 %v419_v45 }
 0x214   :  { %2837 = vmatprep.mubr.msk.bf16.mxu0 %vm213_vm1, %v3538_v29  ;;  %3032 = vmatprep.subr.msk.bf16.mxu0 %vm213_vm1, %v411_v46 }
 0x21b   :  { %2836 = vmatpush3.bf16.xpose.msra.mxu0 %v422_v47 }
 0x222   :  { %2838 = vmatmul.mubr.msk.bf16.vlgmr.msra.gmra.mrb[8].mxu0 %vm213_vm1, %v3544_v33 }
 0x27a   :  { %v2815_v49 = vpop.f32.mrb[0].mxu1 }
 0x27b   :  { %v3580_v51 = vadd.f32 %v2815_v49, %v77_v48  ;;  %v260_v52 = vpop.f32.mrb[1].mxu1 }
 0x27c   :  { %v2816_v54 = vpop.f32.mrb[2].mxu1  ;;  %v3585_v55 = vadd.f32 %v260_v52, %v75_v50 }
 0x27d   :  { %v263_v56 = vpop.f32.mrb[3].mxu1  ;;  %v479_v57 = vsel %vm472_vm2, %v3580_v51, -inf }
 0x27e   :  { %v264_v58 = vadd.f32 %v263_v56, %v76_v53  ;;  %480 = vmax.xlane.f32.xlu0 %v479_v57  ;;  %v473_v60 = vsel %vm472_vm2, %v3585_v55, -inf }
 0x280   :  { %v476_v59 = vsel %vm472_vm2, %v264_v58, -inf }
 0x281   :  { %477 = vmax.xlane.f32.xlu1 %v476_v59 }
 0x282   :  { %474 = vmax.xlane.f32.xlu0 %v473_v60 }
 0x2e5   :  { %v2823_v61 = vpop.f32.mrb[4].mxu0 }
 0x2e6   :  { %v3592_v62 = vadd.f32 %v2823_v61, %v77_v48  ;;  %v2831_v63 = vpop.f32.mrb[4].mxu1  ;;  %v326_v0 = vpop.f32.mrb[5].mxu0 }
 0x2e7   :  { %v3594_v1 = vadd.f32 %v2831_v63, %v77_v48  ;;  %v392_v5 = vpop.f32.mrb[5].mxu1  ;;  %v2824_v6 = vpop.f32.mrb[6].mxu0  ;;  %v3596_v7 = vadd.f32 %v326_v0, %v75_v50 }
 0x2e8   :  { %v2832_v8 = vpop.f32.mrb[6].mxu1  ;;  %v329_v9 = vpop.f32.mrb[7].mxu0  ;;  %v488_v10 = vsel %vm472_vm2, %v3592_v62, -inf  ;;  %v3600_v11 = vadd.f32 %v392_v5, %v75_v50 }
 0x2e9   :  { %v395_v14 = vpop.f32.mrb[7].mxu1  ;;  %v497_v15 = vsel %vm472_vm2, %v3594_v1, -inf  ;;  %489 = vmax.xlane.f32.xlu0 %v488_v10  ;;  %v482_v17 = vsel %vm472_vm2, %v3596_v7, -inf  ;;  %v3608_v18 = vadd.f32 %v329_v9, %v76_v53 }
 0x2ea   :  { %498 = vmax.xlane.f32.xlu1 %v497_v15  ;;  %v3604_v16 = vadd.f32 %v395_v14, %v76_v53  ;;  %v491_v19 = vsel %vm472_vm2, %v3600_v11, -inf }
 0x2eb   :  { %v485_v23 = vsel %vm472_vm2, %v3608_v18, -inf }
 0x2ec   :  { %v494_v22 = vsel %vm472_vm2, %v3604_v16, -inf }
 0x2ed   :  { %483 = vmax.xlane.f32.xlu0 %v482_v17 }
 0x2ee   :  { %492 = vmax.xlane.f32.xlu1 %v491_v19 }
 0x2f1   :  { %495 = vmax.xlane.f32.xlu0 %v494_v22 }
 0x2f2   :  { %486 = vmax.xlane.f32.xlu1 %v485_v23 }
 0x2f5   :  { %v2839_v24 = vpop.f32.mrb[8].mxu0 }
 0x2f6   :  { %v458_v25 = vpop.f32.mrb[9].mxu0  ;;  %v3618_v32 = vadd.f32 %v2839_v24, %v77_v48 }
 0x2f7   :  { %v3616_v27 = vadd.f32 %v458_v25, %v75_v50  ;;  %v2840_v30 = vpop.f32.mrb[10].mxu0 }
 0x2f8   :  { %v461_v31 = vpop.f32.mrb[11].mxu0  ;;  %v506_v35 = vsel %vm472_vm2, %v3618_v32, -inf }
 0x2f9   :  { %v500_v34 = vsel %vm472_vm2, %v3616_v27, -inf  ;;  %v3630_v38 = vadd.f32 %v461_v31, %v76_v53 }
 0x2fa   :  { %501 = vmax.xlane.f32.xlu0 %v500_v34 }
 0x2fb   :  { %v503_v40 = vsel %vm472_vm2, %v3630_v38, -inf }
 0x2fe   :  { %507 = vmax.xlane.f32.xlu0 %v506_v35 }
 0x303   :  { %613 = vrot.lane.b32.xlu1 %v3504_v12, %s3376_s12 }
 0x30e   :  { %v478_v36 = vpop.xlane.xlu1 %477 }
 0x30f   :  { %v510_v37 = vsub.f32 %v264_v58, %v478_v36 }
 0x311   :  { %v523_v39 = vmul.f32 1.442695, %v510_v37 }
 0x313   :  { %3148 = vpow2.f32 %v523_v39 }
 0x314   :  { %676 = vrot.lane.b32.xlu0 %v3520_v20, %s3376_s12  ;;  %v481_v20 = vpop.xlane.xlu0 %480 }
 0x318   :  { %738 = vrot.lane.b32.xlu0 %v3522_v21, %s3376_s12  ;;  %v511_v21 = vsub.f32 %v3580_v51, %v481_v20  ;;  %v475_v42 = vpop.xlane.xlu0 %474 }
 0x319   :  { %v509_v44 = vsub.f32 %v3585_v55, %v475_v42 }
 0x31a   :  { %v525_v43 = vmul.f32 1.442695, %v511_v21 }
 0x31b   :  { %v521_v45 = vmul.f32 1.442695, %v509_v44 }
 0x31c   :  { %3150 = vpow2.f32 %v525_v43 }
 0x31d   :  { %v3634_v41 = vpop.eup %3148  ;;  %3152 = vpow2.f32 %v521_v45 }
 0x31e   :  { %v548_v12 = vsel %vm472_vm2, %v3634_v41, 0.0 }
 0x326   :  { %v3646_v46 = vpop.eup %3150 }
 0x327   :  { %504 = vmax.xlane.f32.xlu1 %v503_v40  ;;  %v3650_v47 = vpop.eup %3152 }
 0x337   :  { %549 = vadd.xlane.f32.xlu0 %v548_v12 }
 0x338   :  { %615 = vrot.lane.b32.xlu1 %v3516_v13, %s3376_s12  ;;  %v551_v13 = vsel %vm472_vm2, %v3646_v46, 0.0 }
 0x33c   :  { %678 = vrot.lane.b32.xlu1 %v3530_v26, %s3376_s12  ;;  %v545_v26 = vsel %vm472_vm2, %v3650_v47, 0.0 }
 0x340   :  { %800 = vrot.lane.b32.xlu1 %v3538_v29, %s3376_s12 }
 0x364   :  { %552 = vadd.xlane.f32.xlu1 %v551_v13 }
 0x368   :  { %546 = vadd.xlane.f32.xlu1 %v545_v26 }
 0x376   :  { %v490_v29 = vpop.xlane.xlu0 %489 }
 0x377   :  { %v499_v48 = vpop.xlane.xlu1 %498  ;;  %v514_v49 = vsub.f32 %v3592_v62, %v490_v29 }
 0x378   :  { %v517_v50 = vsub.f32 %v3594_v1, %v499_v48 }
 0x379   :  { %v531_v51 = vmul.f32 1.442695, %v514_v49 }
 0x37a   :  { %v537_v52 = vmul.f32 1.442695, %v517_v50  ;;  %v484_v53 = vpop.xlane.xlu0 %483 }
 0x37b   :  { %3154 = vpow2.f32 %v531_v51  ;;  %v493_v54 = vpop.xlane.xlu1 %492  ;;  %v512_v55 = vsub.f32 %v3596_v7, %v484_v53 }
 0x37c   :  { %3156 = vpow2.f32 %v537_v52  ;;  %v515_v56 = vsub.f32 %v3600_v11, %v493_v54 }
 0x37d   :  { %v527_v57 = vmul.f32 1.442695, %v512_v55 }
 0x37e   :  { %v533_v58 = vmul.f32 1.442695, %v515_v56  ;;  %v496_v59 = vpop.xlane.xlu0 %495 }
 0x37f   :  { %3158 = vpow2.f32 %v527_v57  ;;  %v487_v60 = vpop.xlane.xlu1 %486  ;;  %v516_v61 = vsub.f32 %v3604_v16, %v496_v59 }
 0x380   :  { %3160 = vpow2.f32 %v533_v58  ;;  %v513_v62 = vsub.f32 %v3608_v18, %v487_v60 }
 0x381   :  { %v535_v63 = vmul.f32 1.442695, %v516_v61 }
 0x382   :  { %v529_v0 = vmul.f32 1.442695, %v513_v62 }
 0x383   :  { %3162 = vpow2.f32 %v535_v63  ;;  %v614_v1 = vpop.permute.xlu1 %613 }
 0x384   :  { %3164 = vpow2.f32 %v529_v0  ;;  %2841 = vmatprep.subr.bf16.mxu1 %v614_v1 }
 0x385   :  { %v3660_v5 = vpop.eup %3154  ;;  %2842 = vmatpush3.bf16.msra.mxu1 %v614_v1 }
 0x386   :  { %v3662_v6 = vpop.eup %3156  ;;  %v560_v7 = vsel %vm472_vm2, %v3660_v5, 0.0 }
 0x387   :  { %v569_v8 = vsel %vm472_vm2, %v3662_v6, 0.0  ;;  %561 = vadd.xlane.f32.xlu0 %v560_v7  ;;  %v502_v9 = vpop.xlane.xlu0 %501 }
 0x388   :  { %570 = vadd.xlane.f32.xlu1 %v569_v8  ;;  %v518_v14 = vsub.f32 %v3616_v27, %v502_v9 }
 0x389   :  { %v3668_v10 = vpop.eup %3158 }
 0x38a   :  { %v3670_v11 = vpop.eup %3160  ;;  %v554_v15 = vsel %vm472_vm2, %v3668_v10, 0.0  ;;  %v539_v23 = vmul.f32 1.442695, %v518_v14 }
 0x38b   :  { %v563_v16 = vsel %vm472_vm2, %v3670_v11, 0.0  ;;  %555 = vadd.xlane.f32.xlu0 %v554_v15  ;;  %v508_v17 = vpop.xlane.xlu0 %507 }
 0x38c   :  { %564 = vadd.xlane.f32.xlu1 %v563_v16  ;;  %v520_v18 = vsub.f32 %v3618_v32, %v508_v17 }
 0x38d   :  { %v3678_v19 = vpop.eup %3162 }
 0x38e   :  { %v3680_v22 = vpop.eup %3164  ;;  %v543_v24 = vmul.f32 1.442695, %v520_v18  ;;  %v566_v25 = vsel %vm472_vm2, %v3678_v19, 0.0 }
 0x38f   :  { %v557_v27 = vsel %vm472_vm2, %v3680_v22, 0.0  ;;  %567 = vadd.xlane.f32.xlu0 %v566_v25  ;;  %v677_v30 = vpop.permute.xlu0 %676 }
 0x390   :  { %3166 = vpow2.f32 %v543_v24  ;;  %558 = vadd.xlane.f32.xlu1 %v557_v27  ;;  %2849 = vmatprep.subr.bf16.mxu0 %v677_v30 }
 0x391   :  { %2850 = vmatpush3.bf16.msra.mxu0 %v677_v30  ;;  %3168 = vpow2.f32 %v539_v23 }
 0x393   :  { %v739_v20 = vpop.permute.xlu0 %738 }
 0x39a   :  { %v3686_v31 = vpop.eup %3166 }
 0x39b   :  { %v578_v32 = vsel %vm472_vm2, %v3686_v31, 0.0  ;;  %v3690_v34 = vpop.eup %3168 }
 0x39c   :  { %579 = vadd.xlane.f32.xlu0 %v578_v32  ;;  %v572_v35 = vsel %vm472_vm2, %v3690_v34, 0.0 }
 0x3a0   :  { %573 = vadd.xlane.f32.xlu0 %v572_v35 }
 0x3b4   :  { %v505_v36 = vpop.xlane.xlu1 %504 }
 0x3b5   :  { %v519_v37 = vsub.f32 %v3630_v38, %v505_v36 }
 0x3b6   :  { %740 = vrot.lane.b32.xlu0 %v3532_v28, %s3376_s12 }
 0x3b7   :  { %v541_v39 = vmul.f32 1.442695, %v519_v37 }
 0x3b8   :  { %v616_v40 = vpop.permute.xlu1 %615 }
 0x3b9   :  { %3170 = vpow2.f32 %v541_v39  ;;  %3033 = vmatprep.subr.msk.bf16.mxu1 %vm624_vm3, %v616_v40  ;;  %v626_v12 = vsel %vm624_vm3, %v616_v40, 0 }
 0x3ba   :  { %2844 = vmatpush3.bf16.msra.mxu1 %v626_v12 }
 0x3bb   :  { %2857 = vmatprep.subr.bf16.mxu1 %v739_v20 }
 0x3bc   :  { %v679_v21 = vpop.permute.xlu1 %678 }
 0x3bd   :  { %3034 = vmatprep.subr.msk.bf16.mxu0 %vm624_vm3, %v679_v21  ;;  %v688_v42 = vsel %vm624_vm3, %v679_v21, 0 }
 0x3be   :  { %2852 = vmatpush3.bf16.msra.mxu0 %v688_v42 }
 0x3c0   :  { %v801_v38 = vpop.permute.xlu1 %800 }
 0x3c1   :  { %2865 = vmatprep.subr.bf16.mxu0 %v801_v38 }
 0x3c3   :  { %v3701_v28 = vpop.eup %3170 }
 0x3c4   :  { %v575_v43 = vsel %vm472_vm2, %v3701_v28, 0.0  ;;  %v550_v44 = vpop.xlane.xlu0 %549 }
 0x3c5   :  { %576 = vadd.xlane.f32.xlu1 %v575_v43 }
 0x3d6   :  { %802 = vrot.lane.b32.xlu1 %v3544_v33, %s3376_s12 }
 0x3f1   :  { %v553_v45 = vpop.xlane.xlu1 %552 }
 0x3f2   :  { %3172 = vrcp.f32 %v553_v45  ;;  %v3130_v45 = vld [vmem:[#allocation5] sm:$0xff]  }
 0x3f3   :  { %3174 = vrcp.f32 %v550_v44 }
 0x3f5   :  { %v547_v13 = vpop.xlane.xlu1 %546 }
 0x3f6   :  { %3176 = vrcp.f32 %v547_v13  ;;  %v3131_v13 = vld [vmem:[#allocation5 + $0x8] sm:$0xff]  }
 0x3fc   :  { %v3173_v26 = vpop.eup %3172 }
 0x3fd   :  { %v3175_v29 = vpop.eup %3174  ;;  %v595_v49 = vmul.f32 %v3173_v26, %v3646_v46 }
 0x3fe   :  { %v594_v51 = vmul.f32 %v3175_v29, %v3634_v41 }
 0x3ff   :  { %v606_v53 = vpack.c.bf16 %v595_v49, %v595_v49 }
 0x400   :  { %v3177_v48 = vpop.eup %3176 }
 0x401   :  { %v593_v50 = vmul.f32 %v3177_v48, %v3650_v47 }
 0x403   :  { %v605_v52 = vpack.c.bf16 %v594_v51, %v593_v50 }
 0x405   :  { %2845 = vmatprep.mubr.msk.bf16.mxu1 %vm472_vm2, %v605_v52 }
 0x406   :  { %2846 = vmatmul.mubr.msk.bf16.vlgmr.msra.gmra.mrb[8].mxu1 %vm472_vm2, %v606_v53 }
 0x407   :  { %2858 = vmatpush3.bf16.msra.mxu1 %v739_v20 }
 0x414   :  { %v562_v33 = vpop.xlane.xlu0 %561 }
 0x415   :  { %v571_v54 = vpop.xlane.xlu1 %570  ;;  %3178 = vrcp.f32 %v562_v33 }
 0x418   :  { %v556_v55 = vpop.xlane.xlu0 %555 }
 0x419   :  { %v565_v56 = vpop.xlane.xlu1 %564 }
 0x41a   :  { %3180 = vrcp.f32 %v565_v56 }
 0x41b   :  { %3182 = vrcp.f32 %v556_v55 }
 0x41c   :  { %v568_v57 = vpop.xlane.xlu0 %567 }
 0x41d   :  { %v559_v46 = vpop.xlane.xlu1 %558  ;;  %3184 = vrcp.f32 %v568_v57 }
 0x41e   :  { %3186 = vrcp.f32 %v559_v46 }
 0x41f   :  { %3188 = vrcp.f32 %v571_v54  ;;  %v3179_v41 = vpop.eup %3178 }
 0x420   :  { %v598_v61 = vmul.f32 %v3179_v41, %v3660_v5 }
 0x422   :  { %v608_v14 = vpack.c.bf16 %v598_v61, %v598_v61 }
 0x424   :  { %v3181_v47 = vpop.eup %3180 }
 0x425   :  { %v3183_v58 = vpop.eup %3182  ;;  %v599_v62 = vmul.f32 %v3181_v47, %v3670_v11 }
 0x426   :  { %v596_v1 = vmul.f32 %v3183_v58, %v3668_v10 }
 0x427   :  { %v3185_v59 = vpop.eup %3184 }
 0x428   :  { %v3187_v60 = vpop.eup %3186  ;;  %v600_v63 = vmul.f32 %v3185_v59, %v3678_v19 }
 0x429   :  { %v580_v0 = vpop.xlane.xlu0 %579  ;;  %v597_v7 = vmul.f32 %v3187_v60, %v3680_v22  ;;  %v3189_v15 = vpop.eup %3188 }
 0x42a   :  { %v609_v8 = vpack.c.bf16 %v600_v63, %v599_v62  ;;  %v601_v5 = vmul.f32 %v3189_v15, %v3662_v6  ;;  %3190 = vrcp.f32 %v580_v0 }
 0x42b   :  { %v607_v9 = vpack.c.bf16 %v597_v7, %v596_v1 }
 0x42c   :  { %2861 = vmatprep.mubr.msk.bf16.mxu1 %vm472_vm2, %v609_v8  ;;  %v610_v10 = vpack.c.bf16 %v601_v5, %v601_v5 }
 0x42d   :  { %2853 = vmatprep.mubr.msk.bf16.mxu0 %vm472_vm2, %v607_v9  ;;  %v574_v16 = vpop.xlane.xlu0 %573 }
 0x42e   :  { %2854 = vmatmul.mubr.msk.bf16.vlgmr.msra.gmra.mrb[12].mxu0 %vm472_vm2, %v608_v14  ;;  %3192 = vrcp.f32 %v574_v16 }
 0x42f   :  { %2866 = vmatpush3.bf16.msra.mxu0 %v801_v38 }
 0x431   :  { %v741_v11 = vpop.permute.xlu0 %740 }
 0x432   :  { %v750_v17 = vsel %vm624_vm3, %v741_v11, 0  ;;  %3035 = vmatprep.subr.msk.bf16.mxu1 %vm624_vm3, %v741_v11 }
 0x433   :  { %2860 = vmatpush3.bf16.msra.mxu1 %v750_v17 }
 0x434   :  { %v3191_v6 = vpop.eup %3190  ;;  %2873 = vmatprep.subr.bf16.mxu1 %v3130_v45 }
 0x435   :  { %v604_v25 = vmul.f32 %v3191_v6, %v3686_v31 }
 0x436   :  { %2862 = vmatmul.mubr.msk.bf16.vlgmr.msra.gmra.mrb[12].mxu1 %vm472_vm2, %v610_v10 }
 0x437   :  { %v612_v35 = vpack.c.bf16 %v604_v25, %v604_v25  ;;  %2874 = vmatpush3.bf16.msra.mxu1 %v3130_v45 }
 0x438   :  { %v3193_v23 = vpop.eup %3192  ;;  %2875 = vmatprep.subr.bf16.mxu1 %v3131_v13 }
 0x439   :  { %v602_v27 = vmul.f32 %v3193_v23, %v3690_v34 }
 0x43b   :  { %2876 = vmatpush3.bf16.msra.mxu1 %v3131_v13 }
 0x452   :  { %v577_v18 = vpop.xlane.xlu1 %576 }
 0x453   :  { %3194 = vrcp.f32 %v577_v18 }
 0x456   :  { %v803_v19 = vpop.permute.xlu1 %802 }
 0x457   :  { %v812_v22 = vsel %vm624_vm3, %v803_v19, 0  ;;  %3036 = vmatprep.subr.msk.bf16.mxu0 %vm624_vm3, %v803_v19 }
 0x458   :  { %2868 = vmatpush3.bf16.msra.mxu0 %v812_v22 }
 0x45d   :  { %v3195_v24 = vpop.eup %3194 }
 0x45e   :  { %v603_v30 = vmul.f32 %v3195_v24, %v3701_v28 }
 0x460   :  { %v611_v32 = vpack.c.bf16 %v603_v30, %v602_v27 }
 0x462   :  { %2869 = vmatprep.mubr.msk.bf16.mxu0 %vm472_vm2, %v611_v32 }
 0x463   :  { %2870 = vmatmul.mubr.msk.bf16.vlgmr.msra.gmra.mrb[16].mxu0 %vm472_vm2, %v612_v35 }
 0x4d9   :  { %v2847_v36 = vpop.f32.mrb[8].mxu1 }
 0x4da   :  { %v662_v37 = vpop.f32.mrb[9].mxu1 }
 0x4db   :  { %v2848_v39 = vpop.f32.mrb[10].mxu1 }
 0x4dc   :  { %v665_v40 = vpop.f32.mrb[11].mxu1 }
 0x501   :  { %v2855_v12 = vpop.f32.mrb[12].mxu0 }
 0x502   :  { %869 = vrot.lane.b32.xlu1 %v2855_v12, %s3377_s13  ;;  %v724_v20 = vpop.f32.mrb[13].mxu0 }
 0x503   :  { %v2856_v31 = vpop.f32.mrb[14].mxu0 }
 0x504   :  { %v727_v21 = vpop.f32.mrb[15].mxu0  ;;  %v3133_v31 = vld [vmem:[#allocation7 + $0x8] sm:$0xff]  }
 0x505   :  { %v3083_v34 = vpack.i.bf16 %v727_v21, %v724_v20  ;;  %v3132_v20 = vld [vmem:[#allocation7] sm:$0xff]  }
 0x506   :  { %2881 = vmatprep.subr.bf16.mxu0 %v3132_v20  ;;  %v3134_v21 = vld [vmem:[%s4171_s6] sm:$0xff]  }
 0x507   :  { %3084 = vrot.lane.b32.xlu0 %v3083_v34, %s3377_s13  ;;  %2882 = vmatpush3.bf16.msra.mxu0 %v3132_v20  ;;  %v3135_v34 = vld [vmem:[%s4171_s6 + $0x8] sm:$0xff]  }
 0x508   :  { %2883 = vmatprep.subr.bf16.mxu0 %v3133_v31  ;;  %2889 = vmatprep.subr.bf16.mxu1 %v3134_v21 }
 0x509   :  { %v2863_v42 = vpop.f32.mrb[12].mxu1 }
 0x50a   :  { %881 = vrot.lane.b32.xlu1 %v2863_v42, %s3378_s14  ;;  %v786_v38 = vpop.f32.mrb[13].mxu1 }
 0x50b   :  { %v2864_v28 = vpop.f32.mrb[14].mxu1  ;;  %2884 = vmatpush3.bf16.msra.mxu0 %v3133_v31 }
 0x50c   :  { %v789_v43 = vpop.f32.mrb[15].mxu1 }
 0x50d   :  { %v3088_v44 = vpack.i.bf16 %v789_v43, %v786_v38  ;;  %v1019_v43 = vlaneseq }
 0x50f   :  { %3089 = vrot.lane.b32.xlu0 %v3088_v44, %s3378_s14 }
 0x536   :  { %v2871_v26 = vpop.f32.mrb[16].mxu0 }
 0x537   :  { %v848_v29 = vpop.f32.mrb[17].mxu0  ;;  %893 = vrot.lane.b32.xlu1 %v2871_v26, %s3379_s15 }
 0x538   :  { %v2872_v48 = vpop.f32.mrb[18].mxu0 }
 0x539   :  { %v851_v49 = vpop.f32.mrb[19].mxu0  ;;  %v3763_v48 = vshrl.u32 %v1019_v43, 7 }
 0x53a   :  { %v3093_v50 = vpack.i.bf16 %v851_v49, %v848_v29 }
 0x53c   :  { %3094 = vrot.lane.b32.xlu0 %v3093_v50, %s3379_s15  ;;  %v1021_v50 = vsub.s32 2, %v3763_v48 }
 0x574   :  { %v870_v51 = vpop.permute.xlu1 %869 }
 0x575   :  { %v900_v41 = vsel %vm213_vm1, %v2847_v36, %v870_v51  ;;  %v3769_v51 = vld [vmem:[%s4172_s7] sm:$0x3f] }
 0x579   :  { %v3085_v52 = vpop.permute.xlu0 %3084 }
 0x57a   :  { %v3087_v54 = vunpack.i.h.bf16 %v3085_v52  ;;  %v3086_v55 = vunpack.i.l.bf16 %v3085_v52  ;;  %v1022_v52 = vrot.slane %v3769_v51, %v1021_v50 }
 0x57c   :  { %v882_v53 = vpop.permute.xlu1 %881  ;;  %v899_v47 = vsel %vm213_vm1, %v665_v40, %v3087_v54  ;;  %v898_v59 = vsel %vm213_vm1, %v662_v37, %v3086_v55 }
 0x57d   :  { %v904_v60 = vsel %vm901_vm4, %v900_v41, %v882_v53  ;;  %v1028_v53 = vsub.s32 3, %v3763_v48 }
 0x581   :  { %v3090_v33 = vpop.permute.xlu0 %3089 }
 0x582   :  { %v3092_v56 = vunpack.i.h.bf16 %v3090_v33  ;;  %v3091_v57 = vunpack.i.l.bf16 %v3090_v33 }
 0x584   :  { %v902_v63 = vsel %vm901_vm4, %v898_v59, %v3091_v57  ;;  %v903_v0 = vsel %vm901_vm4, %v899_v47, %v3092_v56 }
 0x5a9   :  { %v894_v46 = vpop.permute.xlu1 %893 }
 0x5aa   :  { %v907_v1 = vsel %vm472_vm2, %v904_v60, %v894_v46  ;;  %v1029_v46 = vrot.slane %v3769_v51, %v1028_v53 }
 0x5ab   :  { %v909_v14 = vpack.c.bf16 %v907_v1, %v907_v1  ;;  %v3136_v1 = vld [vmem:[%s4171_s6 + $0x10] sm:$0xff]  }
 0x5ae   :  { %v3095_v58 = vpop.permute.xlu0 %3094 }
 0x5af   :  { %v3097_v61 = vunpack.i.h.bf16 %v3095_v58  ;;  %v3096_v62 = vunpack.i.l.bf16 %v3095_v58 }
 0x5b1   :  { %v905_v7 = vsel %vm472_vm2, %v902_v63, %v3096_v62  ;;  %v906_v8 = vsel %vm472_vm2, %v903_v0, %v3097_v61 }
 0x5b2   :  { %v908_v9 = vpack.c.bf16 %v906_v8, %v905_v7  ;;  %v3137_v7 = vld [vmem:[%s4171_s6 + $0x18] sm:$0xff]   ;;  %v1037_v8 = vsub.s32 0, %v3763_v48 }
 0x5b4   :  { %2877 = vmatprep.mubr.msk.bf16.mxu1 %vm114_vm0, %v908_v9  ;;  %v1038_v9 = vrot.slane %v3769_v51, %v1037_v8 }
 0x5b5   :  { %2878 = vmatmul.mubr.msk.bf16.vlgmr.msra.gmra.mrb[16].mxu1 %vm114_vm0, %v909_v14 }
 0x5b6   :  { %2890 = vmatpush3.bf16.msra.mxu1 %v3134_v21 }
 0x5b7   :  { %2891 = vmatprep.subr.bf16.mxu1 %v3135_v34 }
 0x5ba   :  { %2892 = vmatpush3.bf16.msra.mxu1 %v3135_v34 }
 0x5bb   :  { %2893 = vmatprep.subr.bf16.mxu1 %v3136_v1 }
 0x5be   :  { %2894 = vmatpush3.bf16.msra.mxu1 %v3136_v1 }
 0x5bf   :  { %2895 = vmatprep.subr.bf16.mxu1 %v3137_v7 }
 0x5c2   :  { %2896 = vmatpush3.bf16.msra.mxu1 %v3137_v7 }
 0x688   :  { %v2879_v15 = vpop.f32.mrb[16].mxu1 }
 0x689   :  { %v962_v16 = vpop.f32.mrb[17].mxu1  ;;  %v978_v10 = vadd.f32 %v2879_v15, %v3496_v4 }
 0x68a   :  { %v976_v5 = vadd.f32 %v962_v16, %v3486_v2  ;;  %v2880_v11 = vpop.f32.mrb[18].mxu1 }
 0x68b   :  { %v965_v17 = vpop.f32.mrb[19].mxu1  ;;  %v985_v6 = vsel %vm114_vm0, %v978_v10, 0.0 }
 0x68c   :  { %v977_v18 = vadd.f32 %v965_v17, %v3491_v3  ;;  %v979_v19 = vsel %vm114_vm0, %v976_v5, 0.0 }
 0x68d   :  { %980 = vadd.xlane.f32.xlu0 %v979_v19 }
 0x68e   :  { %v982_v22 = vsel %vm114_vm0, %v977_v18, 0.0 }
 0x68f   :  { %983 = vadd.xlane.f32.xlu1 %v982_v22 }
 0x691   :  { %986 = vadd.xlane.f32.xlu0 %v985_v6 }
 0x71a   :  { %v981_v23 = vpop.xlane.xlu0 %980 }
 0x71b   :  { %v989_v24 = vmul.f32 0.03125, %v981_v23 }
 0x71c   :  { %v984_v25 = vpop.xlane.xlu1 %983 }
 0x71d   :  { %v992_v27 = vsub.f32 %v976_v5, %v989_v24  ;;  %v990_v2 = vmul.f32 0.03125, %v984_v25  ;;  %v1112_v24 = vsub.s32 1, %v3763_v48 }
 0x71e   :  { %v987_v30 = vpop.xlane.xlu0 %986 }
 0x71f   :  { %v993_v32 = vsub.f32 %v977_v18, %v990_v2  ;;  %v991_v35 = vmul.f32 0.03125, %v987_v30  ;;  %v995_v4 = vmul.f32 %v992_v27, %v992_v27  ;;  %v1113_v25 = vrot.slane %v3769_v51, %v1112_v24 }
 0x721   :  { %v994_v36 = vsub.f32 %v978_v10, %v991_v35  ;;  %v998_v3 = vsel %vm114_vm0, %v995_v4, 0.0  ;;  %v996_v37 = vmul.f32 %v993_v32, %v993_v32 }
 0x722   :  { %999 = vadd.xlane.f32.xlu0 %v998_v3 }
 0x723   :  { %v1001_v39 = vsel %vm114_vm0, %v996_v37, 0.0  ;;  %v997_v40 = vmul.f32 %v994_v36, %v994_v36 }
 0x724   :  { %1002 = vadd.xlane.f32.xlu1 %v1001_v39 }
 0x725   :  { %v1004_v12 = vsel %vm114_vm0, %v997_v40, 0.0 }
 0x726   :  { %1005 = vadd.xlane.f32.xlu0 %v1004_v12 }
 0x7af   :  { %v1000_v42 = vpop.xlane.xlu0 %999 }
 0x7b0   :  { %v1007_v38 = vmul.f32 0.03125, %v1000_v42 }
 0x7b1   :  { %v1003_v28 = vpop.xlane.xlu1 %1002 }
 0x7b2   :  { %v1010_v44 = vadd.f32 1e-05, %v1007_v38  ;;  %v1008_v45 = vmul.f32 0.03125, %v1003_v28 }
 0x7b3   :  { %v1006_v13 = vpop.xlane.xlu0 %1005 }
 0x7b4   :  { %3196 = vrsqrt.f32 %v1010_v44  ;;  %v1011_v26 = vadd.f32 1e-05, %v1008_v45  ;;  %v1009_v29 = vmul.f32 0.03125, %v1006_v13 }
 0x7b6   :  { %3198 = vrsqrt.f32 %v1011_v26  ;;  %v1012_v49 = vadd.f32 1e-05, %v1009_v29 }
 0x7b8   :  { %3200 = vrsqrt.f32 %v1012_v49 }
 0x7be   :  { %v3197_v33 = vpop.eup %3196 }
 0x7bf   :  { %v1016_v54 = vmul.f32 %v3197_v33, %v992_v27 }
 0x7c0   :  { %v3199_v55 = vpop.eup %3198 }
 0x7c1   :  { %v1017_v56 = vmul.f32 %v3199_v55, %v993_v32  ;;  %v1023_v57 = vmul.f32 %v1022_v52, %v1016_v54  ;;  %v3380_v54 = vmov 0.0|0.0   ;;  %v3382_v55 = vmov 0.0  }
 0x7c2   :  { %v3201_v41 = vpop.eup %3200  ;;  %3019 = vmatprep.subr.bf16.mxu0 %v3380_v54 }
 0x7c3   :  { %v1018_v47 = vmul.f32 %v3201_v41, %v994_v36  ;;  %v1024_v58 = vmul.f32 %v1022_v52, %v1017_v56  ;;  %v1030_v60 = vadd.f32 %v1029_v46, %v1023_v57 }
 0x7c5   :  { %v1025_v59 = vmul.f32 %v1022_v52, %v1018_v47  ;;  %v1031_v61 = vadd.f32 %v1029_v46, %v1024_v58 }
 0x7c7   :  { %v1033_v62 = vpack.c.bf16 %v1031_v61, %v1030_v60  ;;  %v1032_v63 = vadd.f32 %v1029_v46, %v1025_v59 }
 0x7c9   :  { %2885 = vmatprep.mubr.msk.bf16.mxu0 %vm114_vm0, %v1033_v62  ;;  %v1034_v0 = vpack.c.bf16 %v1032_v63, %v1032_v63  ;;  %v1237_v62 = vsub.s32 4, %v3763_v48 }
 0x7cb   :  { %2886 = vmatmul.mubr.msk.bf16.vlgmr.msra.gmra.mrb[20].mxu0 %vm114_vm0, %v1034_v0  ;;  %v1244_v0 = vsub.s32 5, %v3763_v48 }
 0x7cc   :  { %2907 = vmatprep.mubr.msk.f32.mxu0 %vm3381_vm6, %v3382_v55 }
 0x89e   :  { %v2887_v14 = vpop.f32.mrb[20].mxu0 }
 0x89f   :  { %v1100_v15 = vadd.f32 %v2887_v14, %v1038_v9  ;;  %v1091_v16 = vpop.f32.mrb[21].mxu0 }
 0x8a0   :  { %v1092_v5 = vadd.f32 %v1091_v16, %v1038_v9  ;;  %v2888_v11 = vpop.f32.mrb[22].mxu0  ;;  %v1245_v16 = vrot.slane %v3769_v51, %v1244_v0 }
 0x8a1   :  { %v1094_v17 = vpop.f32.mrb[23].mxu0  ;;  %v1107_v18 = vmax.f32 %v1100_v15, 0.0 }
 0x8a2   :  { %v1095_v10 = vadd.f32 %v1094_v17, %v1038_v9  ;;  %v1105_v19 = vmax.f32 %v1092_v5, 0.0 }
 0x8a3   :  { %v1109_v23 = vpack.c.bf16 %v1107_v18, %v1107_v18 }
 0x8a4   :  { %v1106_v22 = vmax.f32 %v1095_v10, 0.0 }
 0x8a6   :  { %v1108_v6 = vpack.c.bf16 %v1106_v22, %v1105_v19 }
 0x8a8   :  { %2897 = vmatprep.mubr.msk.bf16.mxu1 %vm1138_vm5, %v1108_v6  ;;  %v3816_v6 = vld [vmem:[%s4165_s0 + $0x18] sm:$0xff] }
 0x8a9   :  { %2898 = vmatmul.mubr.msk.bf16.vlgmr.msra.gmra.mrb[20].mxu1 %vm1138_vm5, %v1109_v23  ;;  %v3821_v23 = vld [vmem:[%s4165_s0 + $0x20] sm:$0xff] }
 0x97c   :  { %v2899_v27 = vpop.f32.mrb[20].mxu1 }
 0x97d   :  { %v1179_v2 = vpop.f32.mrb[21].mxu1  ;;  %v1188_v30 = vadd.f32 %v2899_v27, %v1113_v25  ;;  %v78_v27 = vld [vmem:[%s4167_s2] sm:$0x3] }
 0x97e   :  { %v1180_v32 = vadd.f32 %v1179_v2, %v1113_v25  ;;  %v2900_v35 = vpop.f32.mrb[22].mxu1  ;;  %v1365_v2 = vpack.c.bf16 %v3821_v23, %v3816_v6 }
 0x97f   :  { %v1182_v4 = vpop.f32.mrb[23].mxu1  ;;  %v1195_v40 = vadd.f32 %v1188_v30, %v1032_v63  ;;  %v1238_v63 = vrot.slane %v3769_v51, %v1237_v62  ;;  %v3138_v51 = vld [vmem:[#allocation2 + $0x10] sm:$0xff]   ;;  %v3139_v30 = vld [vmem:[#allocation2 + $0x18] sm:$0xff]  }
 0x980   :  { %v1183_v36 = vadd.f32 %v1182_v4, %v1113_v25  ;;  %v1193_v3 = vadd.f32 %v1180_v32, %v1030_v60  ;;  %v3834_v32 = vld [vmem:[%s4165_s0 + $0x28] sm:$0xff] }
 0x981   :  { %v1202_v20 = vsel %vm114_vm0, %v1195_v40, 0.0  ;;  %v1366_v35 = vpack.c.bf16 %v3834_v32, %v3834_v32 }
 0x982   :  { %v1196_v37 = vsel %vm114_vm0, %v1193_v3, 0.0  ;;  %v1194_v39 = vadd.f32 %v1183_v36, %v1031_v61 }
 0x983   :  { %1197 = vadd.xlane.f32.xlu1 %v1196_v37 }
 0x984   :  { %v1199_v12 = vsel %vm114_vm0, %v1194_v39, 0.0 }
 0x985   :  { %1200 = vadd.xlane.f32.xlu0 %v1199_v12 }
 0x987   :  { %1203 = vadd.xlane.f32.xlu1 %v1202_v20 }
 0xa10   :  { %v1198_v31 = vpop.xlane.xlu1 %1197 }
 0xa11   :  { %v1205_v21 = vmul.f32 0.03125, %v1198_v31 }
 0xa12   :  { %v1201_v34 = vpop.xlane.xlu0 %1200 }
 0xa13   :  { %v1208_v42 = vsub.f32 %v1193_v3, %v1205_v21  ;;  %v1206_v38 = vmul.f32 0.03125, %v1201_v34 }
 0xa14   :  { %v1204_v28 = vpop.xlane.xlu1 %1203 }
 0xa15   :  { %v1209_v43 = vsub.f32 %v1194_v39, %v1206_v38  ;;  %v1207_v44 = vmul.f32 0.03125, %v1204_v28  ;;  %v1211_v45 = vmul.f32 %v1208_v42, %v1208_v42 }
 0xa17   :  { %v1210_v13 = vsub.f32 %v1195_v40, %v1207_v44  ;;  %v1214_v26 = vsel %vm114_vm0, %v1211_v45, 0.0  ;;  %v1212_v29 = vmul.f32 %v1209_v43, %v1209_v43 }
 0xa18   :  { %1215 = vadd.xlane.f32.xlu0 %v1214_v26 }
 0xa19   :  { %v1217_v49 = vsel %vm114_vm0, %v1212_v29, 0.0  ;;  %v1213_v52 = vmul.f32 %v1210_v13, %v1210_v13 }
 0xa1a   :  { %1218 = vadd.xlane.f32.xlu1 %v1217_v49 }
 0xa1b   :  { %v1220_v33 = vsel %vm114_vm0, %v1213_v52, 0.0 }
 0xa1c   :  { %1221 = vadd.xlane.f32.xlu0 %v1220_v33 }
 0xaa5   :  { %v1216_v56 = vpop.xlane.xlu0 %1215 }
 0xaa6   :  { %v1223_v57 = vmul.f32 0.03125, %v1216_v56 }
 0xaa7   :  { %v1219_v46 = vpop.xlane.xlu1 %1218 }
 0xaa8   :  { %v1226_v41 = vadd.f32 1e-05, %v1223_v57  ;;  %v1224_v47 = vmul.f32 0.03125, %v1219_v46 }
 0xaa9   :  { %v1222_v58 = vpop.xlane.xlu0 %1221 }
 0xaaa   :  { %3202 = vrsqrt.f32 %v1226_v41  ;;  %v1227_v59 = vadd.f32 1e-05, %v1224_v47  ;;  %v1225_v60 = vmul.f32 0.03125, %v1222_v58 }
 0xaac   :  { %3204 = vrsqrt.f32 %v1227_v59  ;;  %v1228_v61 = vadd.f32 1e-05, %v1225_v60 }
 0xaae   :  { %3206 = vrsqrt.f32 %v1228_v61 }
 0xab4   :  { %v3203_v1 = vpop.eup %3202 }
 0xab5   :  { %v1232_v7 = vmul.f32 %v3203_v1, %v1208_v42 }
 0xab6   :  { %v3205_v9 = vpop.eup %3204 }
 0xab7   :  { %v1233_v14 = vmul.f32 %v3205_v9, %v1209_v43  ;;  %v1239_v15 = vmul.f32 %v1238_v63, %v1232_v7 }
 0xab8   :  { %v3207_v5 = vpop.eup %3206 }
 0xab9   :  { %v1240_v11 = vmul.f32 %v1238_v63, %v1233_v14  ;;  %v1234_v17 = vmul.f32 %v3207_v5, %v1210_v13  ;;  %v1246_v10 = vadd.f32 %v1245_v16, %v1239_v15 }
 0xabb   :  { %v1247_v18 = vadd.f32 %v1245_v16, %v1240_v11  ;;  %v1241_v22 = vmul.f32 %v1238_v63, %v1234_v17 }
 0xabd   :  { %v3020_v19 = vpack.c.bf16 %v1247_v18, %v1246_v10  ;;  %v1248_v25 = vadd.f32 %v1245_v16, %v1241_v22  ;;  %v2647_v18 = vld [vmem:[%s4166_s1 + $0x28] sm:$0xff]  ;;  %v2645_v22 = vld [vmem:[%s4166_s1 + $0x18] sm:$0xff] }
 0xabf   :  { %3021 = vmatpush3.bf16.msra.mxu0 %v3020_v19 }
 0xac0   :  { %2905 = vmatprep.subr.mxu0 %v3382_v55 }
 0xac3   :  { %2906 = vmatpush3.msra.mxu0 %v1248_v25 }
 0xac4   :  { %2908 = vmatmul.mubr.msk.f32.vlgmr.msra.gmra.mrb[24].mxu0 %vm472_vm2, %v78_v27  ;;  %2910 = vmatprep.subr.bf16.mxu0 %v3138_v51  ;;  %v2646_v27 = vld [vmem:[%s4166_s1 + $0x20] sm:$0xff] }
 0xac5   :  { %2911 = vmatpush3.bf16.msra.mxu0 %v3138_v51  ;;  %2914 = vmatprep.mubr.msk.bf16.mxu0 %vm114_vm0, %v1365_v2 }
 0xac6   :  { %2912 = vmatprep.subr.bf16.mxu0 %v3139_v30 }
 0xac9   :  { %2913 = vmatpush3.bf16.msra.mxu0 %v3139_v30 }
 0xacc   :  { %2915 = vmatmul.mubr.msk.bf16.vlgmr.msra.gmra.mrb[28].mxu0 %vm114_vm0, %v1366_v35 }
 0xb97   :  { %v3839_v4 = vpop.f32.mrb[24].mxu0 }
 0xb98   :  { %v2909_v36 = vpop.f32.mrb[25].mxu0 }
 0xb9f   :  { %v2916_v3 = vpop.f32.mrb[28].mxu0 }
 0xba0   :  { %1440 = vrot.lane.b32.xlu0 %v2916_v3, %s3373_s18  ;;  %v1419_v37 = vpop.f32.mrb[29].mxu0  ;;  %v3851_v31 = vpack.c.bf16 %v2916_v3, %v2916_v3 }
 0xba1   :  { %v2917_v39 = vpop.f32.mrb[30].mxu0 }
 0xba2   :  { %v1422_v40 = vpop.f32.mrb[31].mxu0 }
 0xba3   :  { %v3842_v12 = vpack.c.bf16 %v1422_v40, %v1419_v37  ;;  %v3098_v20 = vpack.i.bf16 %v1422_v40, %v1419_v37 }
 0xba4   :  { %1449 = vrot.lane.b32.xlu0 %v2916_v3, %s3372_s17 }
 0xba5   :  { %3099 = vrot.lane.b32.xlu1 %v3098_v20, %s3373_s18  ;;  %2922 = vmatprep.mubr.msk.bf16.mxu1 %vm213_vm1, %v3842_v12 }
 0xba8   :  { %1473 = vrot.lane.b32.xlu0 %v3842_v12, %s3375_s27 }
 0xba9   :  { %3104 = vrot.lane.b32.xlu1 %v3098_v20, %s3372_s17 }
 0xbac   :  { %1475 = vrot.lane.b32.xlu0 %v3851_v31, %s3375_s27 }
 0xbad   :  { %3109 = vrot.lane.b32.xlu1 %v3098_v20, %s3374_s26 }
 0xbb1   :  { %1458 = vrot.lane.b32.xlu1 %v2916_v3, %s3374_s26 }
 0xc12   :  { %v1441_v21 = vpop.permute.xlu0 %1440 }
 0xc13   :  { %v3865_v49 = vpack.c.bf16 %v1441_v21, %v1441_v21 }
 0xc16   :  { %v1450_v34 = vpop.permute.xlu0 %1449 }
 0xc17   :  { %v3100_v42 = vpop.permute.xlu1 %3099  ;;  %v3874_v41 = vpack.c.bf16 %v1450_v34, %v1450_v34 }
 0xc18   :  { %v3102_v38 = vunpack.i.h.bf16 %v3100_v42  ;;  %v3101_v28 = vunpack.i.l.bf16 %v3100_v42 }
 0xc1a   :  { %v3857_v43 = vpack.c.bf16 %v3102_v38, %v3101_v28  ;;  %v1474_v44 = vpop.permute.xlu0 %1473 }
 0xc1b   :  { %v1484_v45 = vsel %vm213_vm1, %v1474_v44, 0  ;;  %v3105_v13 = vpop.permute.xlu1 %3104  ;;  %3037 = vmatprep.subr.msk.bf16.mxu1 %vm213_vm1, %v1474_v44 }
 0xc1c   :  { %v3107_v26 = vunpack.i.h.bf16 %v3105_v13  ;;  %v3106_v29 = vunpack.i.l.bf16 %v3105_v13  ;;  %1539 = vrot.lane.b32.xlu1 %v3857_v43, %s3375_s27  ;;  %2919 = vmatpush3.bf16.xpose.msra.mxu1 %v1484_v45 }
 0xc1d   :  { %2930 = vmatprep.mubr.msk.bf16.mxu0 %vm213_vm1, %v3857_v43 }
 0xc1e   :  { %v3867_v52 = vpack.c.bf16 %v3107_v26, %v3106_v29  ;;  %v1476_v33 = vpop.permute.xlu0 %1475 }
 0xc1f   :  { %v3110_v56 = vpop.permute.xlu1 %3109  ;;  %3038 = vmatprep.subr.msk.bf16.mxu1 %vm213_vm1, %v1476_v33  ;;  %v1487_v59 = vsel %vm213_vm1, %v1476_v33, 0 }
 0xc20   :  { %v3112_v57 = vunpack.i.h.bf16 %v3110_v56  ;;  %v3111_v46 = vunpack.i.l.bf16 %v3110_v56  ;;  %1541 = vrot.lane.b32.xlu1 %v3865_v49, %s3375_s27  ;;  %1605 = vrot.lane.b32.xlu0 %v3867_v52, %s3375_s27 }
 0xc22   :  { %v3876_v47 = vpack.c.bf16 %v3112_v57, %v3111_v46 }
 0xc23   :  { %v1459_v58 = vpop.permute.xlu1 %1458 }
 0xc24   :  { %1671 = vrot.lane.b32.xlu1 %v3876_v47, %s3375_s27  ;;  %1607 = vrot.lane.b32.xlu0 %v3874_v41, %s3375_s27  ;;  %v3883_v60 = vpack.c.bf16 %v1459_v58, %v1459_v58 }
 0xc25   :  { %2921 = vmatpush3.bf16.xpose.msra.mxu1 %v1487_v59 }
 0xc28   :  { %1673 = vrot.lane.b32.xlu1 %v3883_v60, %s3375_s27 }
 0xc2c   :  { %2923 = vmatmul.mubr.msk.bf16.vlgmr.msra.gmra.mrb[24].mxu1 %vm213_vm1, %v3851_v31 }
 0xc2d   :  { %2938 = vmatprep.mubr.msk.bf16.mxu1 %vm213_vm1, %v3867_v52 }
 0xc8e   :  { %v1540_v61 = vpop.permute.xlu1 %1539 }
 0xc8f   :  { %v1550_v63 = vsel %vm213_vm1, %v1540_v61, 0  ;;  %3039 = vmatprep.subr.msk.bf16.mxu0 %vm213_vm1, %v1540_v61 }
 0xc90   :  { %2927 = vmatpush3.bf16.xpose.msra.mxu0 %v1550_v63 }
 0xc92   :  { %v1542_v1 = vpop.permute.xlu1 %1541  ;;  %v1606_v7 = vpop.permute.xlu0 %1605 }
 0xc93   :  { %v1616_v9 = vsel %vm213_vm1, %v1606_v7, 0  ;;  %3040 = vmatprep.subr.msk.bf16.mxu0 %vm213_vm1, %v1542_v1  ;;  %3041 = vmatprep.subr.msk.bf16.mxu1 %vm213_vm1, %v1606_v7  ;;  %v1553_v15 = vsel %vm213_vm1, %v1542_v1, 0 }
 0xc94   :  { %2935 = vmatpush3.bf16.xpose.msra.mxu1 %v1616_v9 }
 0xc96   :  { %v1608_v14 = vpop.permute.xlu0 %1607  ;;  %v1672_v16 = vpop.permute.xlu1 %1671 }
 0xc97   :  { %3042 = vmatprep.subr.msk.bf16.mxu1 %vm213_vm1, %v1608_v14  ;;  %v1619_v5 = vsel %vm213_vm1, %v1608_v14, 0  ;;  %v1682_v11 = vsel %vm213_vm1, %v1672_v16, 0 }
 0xc98   :  { %2929 = vmatpush3.bf16.xpose.msra.mxu0 %v1553_v15 }
 0xc99   :  { %3043 = vmatprep.subr.msk.bf16.mxu0 %vm213_vm1, %v1672_v16 }
 0xc9a   :  { %v1674_v17 = vpop.permute.xlu1 %1673 }
 0xc9b   :  { %v1685_v10 = vsel %vm213_vm1, %v1674_v17, 0 }
 0xc9c   :  { %2937 = vmatpush3.bf16.xpose.msra.mxu1 %v1619_v5 }
 0xc9f   :  { %2931 = vmatmul.mubr.msk.bf16.vlgmr.msra.gmra.mrb[32].mxu0 %vm213_vm1, %v3865_v49 }
 0xca0   :  { %2943 = vmatpush3.bf16.xpose.msra.mxu0 %v1682_v11  ;;  %2946 = vmatprep.mubr.msk.bf16.mxu0 %vm213_vm1, %v3876_v47 }
 0xca1   :  { %3044 = vmatprep.subr.msk.bf16.mxu0 %vm213_vm1, %v1674_v17 }
 0xca3   :  { %2939 = vmatmul.mubr.msk.bf16.vlgmr.msra.gmra.mrb[28].mxu1 %vm213_vm1, %v3874_v41 }
 0xca8   :  { %2945 = vmatpush3.bf16.xpose.msra.mxu0 %v1685_v10 }
 0xcaf   :  { %2947 = vmatmul.mubr.msk.bf16.vlgmr.msra.gmra.mrb[36].mxu0 %vm213_vm1, %v3883_v60 }
 0xcff   :  { %v2924_v19 = vpop.f32.mrb[24].mxu1 }
 0xd00   :  { %v3917_v51 = vadd.f32 %v2924_v19, %v2647_v18  ;;  %v1523_v25 = vpop.f32.mrb[25].mxu1 }
 0xd01   :  { %v2925_v2 = vpop.f32.mrb[26].mxu1  ;;  %v3922_v30 = vadd.f32 %v2645_v22, %v1523_v25 }
 0xd02   :  { %v1526_v35 = vpop.f32.mrb[27].mxu1  ;;  %v1741_v36 = vsel %vm472_vm2, %v3917_v51, -inf }
 0xd03   :  { %v1527_v3 = vadd.f32 %v2646_v27, %v1526_v35  ;;  %1742 = vmax.xlane.f32.xlu0 %v1741_v36  ;;  %v1735_v39 = vsel %vm472_vm2, %v3922_v30, -inf }
 0xd05   :  { %v1738_v37 = vsel %vm472_vm2, %v1527_v3, -inf }
 0xd06   :  { %1739 = vmax.xlane.f32.xlu1 %v1738_v37 }
 0xd07   :  { %1736 = vmax.xlane.f32.xlu0 %v1735_v39 }
 0xd72   :  { %v2932_v40 = vpop.f32.mrb[32].mxu0 }
 0xd73   :  { %v3929_v20 = vadd.f32 %v2932_v40, %v2647_v18  ;;  %v1589_v21 = vpop.f32.mrb[33].mxu0 }
 0xd74   :  { %v2933_v34 = vpop.f32.mrb[34].mxu0  ;;  %v3931_v42 = vadd.f32 %v2645_v22, %v1589_v21 }
 0xd75   :  { %v1592_v38 = vpop.f32.mrb[35].mxu0  ;;  %v1750_v28 = vsel %vm472_vm2, %v3929_v20, -inf }
 0xd76   :  { %v2940_v44 = vpop.f32.mrb[28].mxu1  ;;  %1751 = vmax.xlane.f32.xlu0 %v1750_v28  ;;  %v1744_v57 = vsel %vm472_vm2, %v3931_v42, -inf  ;;  %v3947_v59 = vadd.f32 %v2646_v27, %v1592_v38 }
 0xd77   :  { %v3935_v45 = vadd.f32 %v2940_v44, %v2647_v18  ;;  %v1655_v13 = vpop.f32.mrb[29].mxu1 }
 0xd78   :  { %v2941_v26 = vpop.f32.mrb[30].mxu1  ;;  %v3937_v29 = vadd.f32 %v2645_v22, %v1655_v13  ;;  %v1747_v63 = vsel %vm472_vm2, %v3947_v59, -inf }
 0xd79   :  { %v1658_v33 = vpop.f32.mrb[31].mxu1  ;;  %v1759_v56 = vsel %vm472_vm2, %v3935_v45, -inf }
 0xd7a   :  { %v3943_v46 = vadd.f32 %v2646_v27, %v1658_v33  ;;  %1760 = vmax.xlane.f32.xlu1 %v1759_v56  ;;  %1745 = vmax.xlane.f32.xlu0 %v1744_v57  ;;  %v1753_v61 = vsel %vm472_vm2, %v3937_v29, -inf }
 0xd7c   :  { %v1756_v58 = vsel %vm472_vm2, %v3943_v46, -inf }
 0xd7e   :  { %1754 = vmax.xlane.f32.xlu1 %v1753_v61  ;;  %1757 = vmax.xlane.f32.xlu0 %v1756_v58 }
 0xd82   :  { %v2948_v1 = vpop.f32.mrb[36].mxu0  ;;  %1748 = vmax.xlane.f32.xlu1 %v1747_v63 }
 0xd83   :  { %v1721_v7 = vpop.f32.mrb[37].mxu0  ;;  %v3955_v16 = vadd.f32 %v2948_v1, %v2647_v18 }
 0xd84   :  { %v3953_v9 = vadd.f32 %v2645_v22, %v1721_v7  ;;  %v2949_v14 = vpop.f32.mrb[38].mxu0 }
 0xd85   :  { %v1724_v15 = vpop.f32.mrb[39].mxu0  ;;  %v1768_v11 = vsel %vm472_vm2, %v3955_v16, -inf }
 0xd86   :  { %v1762_v5 = vsel %vm472_vm2, %v3953_v9, -inf  ;;  %v3967_v18 = vadd.f32 %v2646_v27, %v1724_v15 }
 0xd87   :  { %1763 = vmax.xlane.f32.xlu0 %v1762_v5 }
 0xd88   :  { %v1765_v22 = vsel %vm472_vm2, %v3967_v18, -inf }
 0xd8b   :  { %1769 = vmax.xlane.f32.xlu0 %v1768_v11 }
 0xd93   :  { %1875 = vrot.lane.b32.xlu1 %v3842_v12, %s3376_s12  ;;  %v1740_v17 = vpop.xlane.xlu1 %1739 }
 0xd94   :  { %v1772_v10 = vsub.f32 %v1527_v3, %v1740_v17 }
 0xd96   :  { %v1785_v19 = vmul.f32 1.442695, %v1772_v10 }
 0xd98   :  { %3208 = vpow2.f32 %v1785_v19 }
 0xda1   :  { %1937 = vrot.lane.b32.xlu0 %v3857_v43, %s3376_s12  ;;  %v1743_v43 = vpop.xlane.xlu0 %1742 }
 0xda2   :  { %v3971_v25 = vpop.eup %3208 }
 0xda3   :  { %v1810_v12 = vsel %vm472_vm2, %v3971_v25, 0.0 }
 0xda5   :  { %1999 = vrot.lane.b32.xlu0 %v3867_v52, %s3376_s12  ;;  %v1773_v52 = vsub.f32 %v3917_v51, %v1743_v43  ;;  %v1737_v27 = vpop.xlane.xlu0 %1736 }
 0xda6   :  { %v1771_v35 = vsub.f32 %v3922_v30, %v1737_v27 }
 0xda7   :  { %v1787_v2 = vmul.f32 1.442695, %v1773_v52 }
 0xda8   :  { %v1783_v36 = vmul.f32 1.442695, %v1771_v35 }
 0xda9   :  { %3210 = vpow2.f32 %v1787_v2 }
 0xdaa   :  { %3212 = vpow2.f32 %v1783_v36 }
 0xdb3   :  { %v3983_v3 = vpop.eup %3210 }
 0xdb4   :  { %v3987_v37 = vpop.eup %3212 }
 0xdb7   :  { %1766 = vmax.xlane.f32.xlu1 %v1765_v22 }
 0xdc4   :  { %1811 = vadd.xlane.f32.xlu0 %v1810_v12 }
 0xdc8   :  { %1877 = vrot.lane.b32.xlu1 %v3851_v31, %s3376_s12  ;;  %v1813_v31 = vsel %vm472_vm2, %v3983_v3, 0.0 }
 0xdcc   :  { %1939 = vrot.lane.b32.xlu1 %v3865_v49, %s3376_s12  ;;  %v1807_v49 = vsel %vm472_vm2, %v3987_v37, 0.0 }
 0xdd0   :  { %2061 = vrot.lane.b32.xlu1 %v3876_v47, %s3376_s12 }
 0xdf4   :  { %1814 = vadd.xlane.f32.xlu1 %v1813_v31 }
 0xdf8   :  { %1808 = vadd.xlane.f32.xlu1 %v1807_v49 }
 0xe03   :  { %v1752_v47 = vpop.xlane.xlu0 %1751 }
 0xe04   :  { %v1776_v51 = vsub.f32 %v3929_v20, %v1752_v47 }
 0xe06   :  { %v1793_v39 = vmul.f32 1.442695, %v1776_v51 }
 0xe07   :  { %v1761_v30 = vpop.xlane.xlu1 %1760  ;;  %v1746_v40 = vpop.xlane.xlu0 %1745 }
 0xe08   :  { %3214 = vpow2.f32 %v1793_v39  ;;  %v1779_v21 = vsub.f32 %v3935_v45, %v1761_v30  ;;  %v1774_v34 = vsub.f32 %v3931_v42, %v1746_v40 }
 0xe0a   :  { %v1799_v38 = vmul.f32 1.442695, %v1779_v21  ;;  %v1789_v28 = vmul.f32 1.442695, %v1774_v34 }
 0xe0b   :  { %v1755_v44 = vpop.xlane.xlu1 %1754  ;;  %v1758_v13 = vpop.xlane.xlu0 %1757 }
 0xe0c   :  { %3216 = vpow2.f32 %v1799_v38  ;;  %v1777_v26 = vsub.f32 %v3937_v29, %v1755_v44  ;;  %v1778_v33 = vsub.f32 %v3943_v46, %v1758_v13 }
 0xe0d   :  { %3218 = vpow2.f32 %v1789_v28 }
 0xe0e   :  { %v1795_v56 = vmul.f32 1.442695, %v1777_v26  ;;  %v1797_v20 = vmul.f32 1.442695, %v1778_v33 }
 0xe0f   :  { %v1749_v57 = vpop.xlane.xlu1 %1748 }
 0xe10   :  { %3220 = vpow2.f32 %v1795_v56  ;;  %v1775_v58 = vsub.f32 %v3947_v59, %v1749_v57 }
 0xe11   :  { %3222 = vpow2.f32 %v1797_v20 }
 0xe12   :  { %v3997_v45 = vpop.eup %3214  ;;  %v1791_v42 = vmul.f32 1.442695, %v1775_v58 }
 0xe13   :  { %v1876_v61 = vpop.permute.xlu1 %1875  ;;  %v1822_v63 = vsel %vm472_vm2, %v3997_v45, 0.0 }
 0xe14   :  { %3224 = vpow2.f32 %v1791_v42  ;;  %2950 = vmatprep.subr.bf16.mxu1 %v1876_v61  ;;  %1823 = vadd.xlane.f32.xlu0 %v1822_v63  ;;  %v1764_v29 = vpop.xlane.xlu0 %1763 }
 0xe15   :  { %2951 = vmatpush3.bf16.msra.mxu1 %v1876_v61  ;;  %v1780_v7 = vsub.f32 %v3953_v9, %v1764_v29 }
 0xe16   :  { %v4001_v46 = vpop.eup %3216 }
 0xe17   :  { %v4003_v1 = vpop.eup %3218  ;;  %v1831_v59 = vsel %vm472_vm2, %v4001_v46, 0.0  ;;  %v1801_v10 = vmul.f32 1.442695, %v1780_v7 }
 0xe18   :  { %1832 = vadd.xlane.f32.xlu1 %v1831_v59  ;;  %v1816_v14 = vsel %vm472_vm2, %v4003_v1, 0.0  ;;  %v1770_v15 = vpop.xlane.xlu0 %1769 }
 0xe19   :  { %1817 = vadd.xlane.f32.xlu0 %v1816_v14  ;;  %v1782_v5 = vsub.f32 %v3955_v16, %v1770_v15 }
 0xe1a   :  { %v4011_v11 = vpop.eup %3220 }
 0xe1b   :  { %v4013_v17 = vpop.eup %3222  ;;  %v1805_v19 = vmul.f32 1.442695, %v1782_v5  ;;  %v1825_v9 = vsel %vm472_vm2, %v4011_v11, 0.0 }
 0xe1c   :  { %1826 = vadd.xlane.f32.xlu1 %v1825_v9  ;;  %v1828_v22 = vsel %vm472_vm2, %v4013_v17, 0.0  ;;  %v1938_v12 = vpop.permute.xlu0 %1937 }
 0xe1d   :  { %3226 = vpow2.f32 %v1805_v19  ;;  %1829 = vadd.xlane.f32.xlu0 %v1828_v22  ;;  %2958 = vmatprep.subr.bf16.mxu0 %v1938_v12 }
 0xe1e   :  { %v4019_v43 = vpop.eup %3224  ;;  %2959 = vmatpush3.bf16.msra.mxu0 %v1938_v12  ;;  %3228 = vpow2.f32 %v1801_v10 }
 0xe1f   :  { %v1819_v16 = vsel %vm472_vm2, %v4019_v43, 0.0 }
 0xe20   :  { %1820 = vadd.xlane.f32.xlu1 %v1819_v16  ;;  %v2000_v39 = vpop.permute.xlu0 %1999 }
 0xe27   :  { %v4023_v52 = vpop.eup %3226 }
 0xe28   :  { %v1840_v27 = vsel %vm472_vm2, %v4023_v52, 0.0  ;;  %v4027_v2 = vpop.eup %3228 }
 0xe29   :  { %1841 = vadd.xlane.f32.xlu0 %v1840_v27  ;;  %v1834_v35 = vsel %vm472_vm2, %v4027_v2, 0.0 }
 0xe2d   :  { %1835 = vadd.xlane.f32.xlu0 %v1834_v35 }
 0xe43   :  { %2001 = vrot.lane.b32.xlu0 %v3874_v41, %s3376_s12 }
 0xe44   :  { %v1767_v36 = vpop.xlane.xlu1 %1766 }
 0xe45   :  { %v1781_v31 = vsub.f32 %v3967_v18, %v1767_v36 }
 0xe47   :  { %v1803_v49 = vmul.f32 1.442695, %v1781_v31 }
 0xe48   :  { %v1878_v47 = vpop.permute.xlu1 %1877 }
 0xe49   :  { %3230 = vpow2.f32 %v1803_v49  ;;  %v1887_v51 = vsel %vm624_vm3, %v1878_v47, 0  ;;  %3045 = vmatprep.subr.msk.bf16.mxu1 %vm624_vm3, %v1878_v47 }
 0xe4a   :  { %2953 = vmatpush3.bf16.msra.mxu1 %v1887_v51 }
 0xe4b   :  { %2966 = vmatprep.subr.bf16.mxu1 %v2000_v39 }
 0xe4c   :  { %v1940_v30 = vpop.permute.xlu1 %1939 }
 0xe4d   :  { %v1949_v40 = vsel %vm624_vm3, %v1940_v30, 0  ;;  %3046 = vmatprep.subr.msk.bf16.mxu0 %vm624_vm3, %v1940_v30 }
 0xe4e   :  { %2961 = vmatpush3.bf16.msra.mxu0 %v1949_v40 }
 0xe50   :  { %v2062_v41 = vpop.permute.xlu1 %2061 }
 0xe51   :  { %2974 = vmatprep.subr.bf16.mxu0 %v2062_v41  ;;  %v1812_v34 = vpop.xlane.xlu0 %1811 }
 0xe53   :  { %v4038_v21 = vpop.eup %3230 }
 0xe54   :  { %v1837_v18 = vsel %vm472_vm2, %v4038_v21, 0.0 }
 0xe55   :  { %1838 = vadd.xlane.f32.xlu1 %v1837_v18 }
 0xe66   :  { %2063 = vrot.lane.b32.xlu1 %v3883_v60, %s3376_s12 }
 0xe81   :  { %v1815_v38 = vpop.xlane.xlu1 %1814 }
 0xe82   :  { %3232 = vrcp.f32 %v1815_v38 }
 0xe83   :  { %3234 = vrcp.f32 %v1812_v34 }
 0xe85   :  { %v1809_v28 = vpop.xlane.xlu1 %1808 }
 0xe86   :  { %3236 = vrcp.f32 %v1809_v28 }
 0xe8c   :  { %v3233_v44 = vpop.eup %3232 }
 0xe8d   :  { %v3235_v13 = vpop.eup %3234  ;;  %v1857_v33 = vmul.f32 %v3233_v44, %v3983_v3 }
 0xe8e   :  { %v1856_v20 = vmul.f32 %v3235_v13, %v3971_v25 }
 0xe8f   :  { %v1868_v58 = vpack.c.bf16 %v1857_v33, %v1857_v33 }
 0xe90   :  { %v3237_v26 = vpop.eup %3236 }
 0xe91   :  { %v1855_v56 = vmul.f32 %v3237_v26, %v3987_v37 }
 0xe93   :  { %v1867_v57 = vpack.c.bf16 %v1856_v20, %v1855_v56 }
 0xe95   :  { %2954 = vmatprep.mubr.msk.bf16.mxu1 %vm472_vm2, %v1867_v57 }
 0xe96   :  { %2955 = vmatmul.mubr.msk.bf16.vlgmr.msra.gmra.mrb[32].mxu1 %vm472_vm2, %v1868_v58 }
 0xe97   :  { %2967 = vmatpush3.bf16.msra.mxu1 %v2000_v39 }
 0xea1   :  { %v1824_v60 = vpop.xlane.xlu0 %1823 }
 0xea2   :  { %3238 = vrcp.f32 %v1824_v60  ;;  %v3140_v60 = vld [vmem:[#allocation5 + $0x10] sm:$0xff]  }
 0xea5   :  { %v1833_v42 = vpop.xlane.xlu1 %1832 }
 0xea6   :  { %v1818_v61 = vpop.xlane.xlu0 %1817 }
 0xea9   :  { %v1827_v63 = vpop.xlane.xlu1 %1826 }
 0xeaa   :  { %3240 = vrcp.f32 %v1827_v63  ;;  %v1830_v29 = vpop.xlane.xlu0 %1829 }
 0xeab   :  { %3242 = vrcp.f32 %v1830_v29 }
 0xeac   :  { %3244 = vrcp.f32 %v1818_v61  ;;  %v3239_v25 = vpop.eup %3238 }
 0xead   :  { %v1821_v3 = vpop.xlane.xlu1 %1820  ;;  %v1860_v19 = vmul.f32 %v3239_v25, %v3997_v45 }
 0xeae   :  { %3246 = vrcp.f32 %v1821_v3 }
 0xeaf   :  { %3248 = vrcp.f32 %v1833_v42  ;;  %v1870_v36 = vpack.c.bf16 %v1860_v19, %v1860_v19  ;;  %v3141_v42 = vld [vmem:[#allocation5 + $0x18] sm:$0xff]  }
 0xeb4   :  { %v3241_v37 = vpop.eup %3240 }
 0xeb5   :  { %v3243_v7 = vpop.eup %3242  ;;  %v1861_v59 = vmul.f32 %v3241_v37, %v4011_v11 }
 0xeb6   :  { %v3245_v14 = vpop.eup %3244  ;;  %v1842_v15 = vpop.xlane.xlu0 %1841  ;;  %v1862_v5 = vmul.f32 %v3243_v7, %v4013_v17 }
 0xeb7   :  { %v1858_v22 = vmul.f32 %v3245_v14, %v4003_v1  ;;  %3250 = vrcp.f32 %v1842_v15 }
 0xeb8   :  { %v3247_v10 = vpop.eup %3246  ;;  %v1871_v9 = vpack.c.bf16 %v1862_v5, %v1861_v59 }
 0xeb9   :  { %v1859_v12 = vmul.f32 %v3247_v10, %v4019_v43  ;;  %v3249_v16 = vpop.eup %3248 }
 0xeba   :  { %2970 = vmatprep.mubr.msk.bf16.mxu1 %vm472_vm2, %v1871_v9  ;;  %v1836_v27 = vpop.xlane.xlu0 %1835  ;;  %v1863_v11 = vmul.f32 %v3249_v16, %v4001_v46 }
 0xebb   :  { %v1869_v35 = vpack.c.bf16 %v1859_v12, %v1858_v22  ;;  %3252 = vrcp.f32 %v1836_v27 }
 0xebc   :  { %v1872_v1 = vpack.c.bf16 %v1863_v11, %v1863_v11 }
 0xebd   :  { %2962 = vmatprep.mubr.msk.bf16.mxu0 %vm472_vm2, %v1869_v35 }
 0xebe   :  { %2963 = vmatmul.mubr.msk.bf16.vlgmr.msra.gmra.mrb[40].mxu0 %vm472_vm2, %v1870_v36  ;;  %v2002_v17 = vpop.permute.xlu0 %2001 }
 0xebf   :  { %2975 = vmatpush3.bf16.msra.mxu0 %v2062_v41  ;;  %v2011_v45 = vsel %vm624_vm3, %v2002_v17, 0  ;;  %3047 = vmatprep.subr.msk.bf16.mxu1 %vm624_vm3, %v2002_v17 }
 0xec0   :  { %2969 = vmatpush3.bf16.msra.mxu1 %v2011_v45 }
 0xec1   :  { %v3251_v49 = vpop.eup %3250  ;;  %2982 = vmatprep.subr.bf16.mxu1 %v3140_v60 }
 0xec2   :  { %v1866_v39 = vmul.f32 %v3251_v49, %v4023_v52 }
 0xec3   :  { %2971 = vmatmul.mubr.msk.bf16.vlgmr.msra.gmra.mrb[36].mxu1 %vm472_vm2, %v1872_v1 }
 0xec4   :  { %v1874_v18 = vpack.c.bf16 %v1866_v39, %v1866_v39  ;;  %2983 = vmatpush3.bf16.msra.mxu1 %v3140_v60 }
 0xec5   :  { %v3253_v47 = vpop.eup %3252  ;;  %2984 = vmatprep.subr.bf16.mxu1 %v3141_v42 }
 0xec6   :  { %v1864_v30 = vmul.f32 %v3253_v47, %v4027_v2 }
 0xec8   :  { %2985 = vmatpush3.bf16.msra.mxu1 %v3141_v42  ;;  %v3142_v42 = vld [vmem:[#allocation7 + $0x10] sm:$0xff]  }
 0xee2   :  { %v1839_v43 = vpop.xlane.xlu1 %1838 }
 0xee3   :  { %3254 = vrcp.f32 %v1839_v43 }
 0xee6   :  { %v2064_v31 = vpop.permute.xlu1 %2063 }
 0xee7   :  { %v2073_v46 = vsel %vm624_vm3, %v2064_v31, 0  ;;  %3048 = vmatprep.subr.msk.bf16.mxu0 %vm624_vm3, %v2064_v31 }
 0xee8   :  { %2977 = vmatpush3.bf16.msra.mxu0 %v2073_v46 }
 0xee9   :  { %2990 = vmatprep.subr.bf16.mxu0 %v3142_v42 }
 0xeed   :  { %v3255_v51 = vpop.eup %3254 }
 0xeee   :  { %v1865_v40 = vmul.f32 %v3255_v51, %v4038_v21 }
 0xef0   :  { %v1873_v41 = vpack.c.bf16 %v1865_v40, %v1864_v30 }
 0xef2   :  { %2978 = vmatprep.mubr.msk.bf16.mxu0 %vm472_vm2, %v1873_v41 }
 0xef3   :  { %2979 = vmatmul.mubr.msk.bf16.vlgmr.msra.gmra.mrb[44].mxu0 %vm472_vm2, %v1874_v18 }
 0xef4   :  { %2991 = vmatpush3.bf16.msra.mxu0 %v3142_v42 }
 0xf69   :  { %v2956_v34 = vpop.f32.mrb[32].mxu1 }
 0xf6a   :  { %v1923_v38 = vpop.f32.mrb[33].mxu1 }
 0xf6b   :  { %v2957_v28 = vpop.f32.mrb[34].mxu1 }
 0xf6c   :  { %v1926_v44 = vpop.f32.mrb[35].mxu1 }
 0xf91   :  { %v2964_v13 = vpop.f32.mrb[40].mxu0 }
 0xf92   :  { %2130 = vrot.lane.b32.xlu1 %v2964_v13, %s3377_s13  ;;  %v1985_v26 = vpop.f32.mrb[41].mxu0 }
 0xf93   :  { %v2965_v33 = vpop.f32.mrb[42].mxu0 }
 0xf94   :  { %v1988_v52 = vpop.f32.mrb[43].mxu0 }
 0xf95   :  { %v3113_v56 = vpack.i.bf16 %v1988_v52, %v1985_v26 }
 0xf96   :  { %v2972_v2 = vpop.f32.mrb[36].mxu1 }
 0xf97   :  { %3114 = vrot.lane.b32.xlu0 %v3113_v56, %s3377_s13  ;;  %2142 = vrot.lane.b32.xlu1 %v2972_v2, %s3378_s14  ;;  %v2047_v21 = vpop.f32.mrb[37].mxu1 }
 0xf98   :  { %v2973_v20 = vpop.f32.mrb[38].mxu1 }
 0xf99   :  { %v2050_v57 = vpop.f32.mrb[39].mxu1 }
 0xf9a   :  { %v3118_v58 = vpack.i.bf16 %v2050_v57, %v2047_v21 }
 0xf9c   :  { %3119 = vrot.lane.b32.xlu0 %v3118_v58, %s3378_s14 }
 0xfc6   :  { %v2980_v61 = vpop.f32.mrb[44].mxu0 }
 0xfc7   :  { %v2109_v63 = vpop.f32.mrb[45].mxu0  ;;  %2154 = vrot.lane.b32.xlu1 %v2980_v61, %s3379_s15  ;;  %v3143_v61 = vld [vmem:[#allocation7 + $0x18] sm:$0xff]  }
 0xfc8   :  { %v2981_v29 = vpop.f32.mrb[46].mxu0  ;;  %2992 = vmatprep.subr.bf16.mxu0 %v3143_v61 }
 0xfc9   :  { %v2112_v3 = vpop.f32.mrb[47].mxu0  ;;  %2993 = vmatpush3.bf16.msra.mxu0 %v3143_v61  ;;  %v3145_v29 = vld [vmem:[%s4171_s6 + $0x28] sm:$0xff]  }
 0xfca   :  { %v3123_v25 = vpack.i.bf16 %v2112_v3, %v2109_v63  ;;  %3022 = vmatprep.subr.bf16.mxu0 %v3380_v54  ;;  %v3144_v63 = vld [vmem:[%s4171_s6 + $0x20] sm:$0xff]  }
 0xfcb   :  { %2998 = vmatprep.subr.bf16.mxu1 %v3144_v63 }
 0xfcc   :  { %3124 = vrot.lane.b32.xlu0 %v3123_v25, %s3379_s15 }
0x1004   :  { %v2131_v37 = vpop.permute.xlu1 %2130 }
0x1005   :  { %v2161_v9 = vsel %vm213_vm1, %v2956_v34, %v2131_v37 }
0x1009   :  { %v3115_v7 = vpop.permute.xlu0 %3114  ;;  %v2143_v59 = vpop.permute.xlu1 %2142 }
0x100a   :  { %v3117_v15 = vunpack.i.h.bf16 %v3115_v7  ;;  %v3116_v5 = vunpack.i.l.bf16 %v3115_v7  ;;  %v2164_v12 = vsel %vm901_vm4, %v2161_v9, %v2143_v59 }
0x100c   :  { %v2160_v27 = vsel %vm213_vm1, %v1926_v44, %v3117_v15  ;;  %v2159_v35 = vsel %vm213_vm1, %v1923_v38, %v3116_v5 }
0x100e   :  { %v3120_v14 = vpop.permute.xlu0 %3119 }
0x100f   :  { %v3122_v10 = vunpack.i.h.bf16 %v3120_v14  ;;  %v3121_v19 = vunpack.i.l.bf16 %v3120_v14 }
0x1011   :  { %v2162_v17 = vsel %vm901_vm4, %v2159_v35, %v3121_v19  ;;  %v2163_v45 = vsel %vm901_vm4, %v2160_v27, %v3122_v10  ;;  %v4104_v10 = vld [vmem:[%s4172_s7 + $0x8] sm:$0x3f] }
0x1012   :  { %v2281_v19 = vrot.slane %v4104_v10, %v1021_v50  ;;  %v2288_v35 = vrot.slane %v4104_v10, %v1028_v53  ;;  %v3146_v53 = vld [vmem:[%s4171_s6 + $0x30] sm:$0xff]  }
0x1039   :  { %v2155_v22 = vpop.permute.xlu1 %2154 }
0x103a   :  { %v2167_v1 = vsel %vm472_vm2, %v2164_v12, %v2155_v22 }
0x103b   :  { %v2169_v49 = vpack.c.bf16 %v2167_v1, %v2167_v1 }
0x103e   :  { %v3125_v16 = vpop.permute.xlu0 %3124 }
0x103f   :  { %v3127_v36 = vunpack.i.h.bf16 %v3125_v16  ;;  %v3126_v11 = vunpack.i.l.bf16 %v3125_v16 }
0x1041   :  { %v2165_v43 = vsel %vm472_vm2, %v2162_v17, %v3126_v11  ;;  %v2166_v31 = vsel %vm472_vm2, %v2163_v45, %v3127_v36 }
0x1042   :  { %v2168_v46 = vpack.c.bf16 %v2166_v31, %v2165_v43 }
0x1044   :  { %2986 = vmatprep.mubr.msk.bf16.mxu1 %vm114_vm0, %v2168_v46 }
0x1045   :  { %2987 = vmatmul.mubr.msk.bf16.vlgmr.msra.gmra.mrb[40].mxu1 %vm114_vm0, %v2169_v49  ;;  %v3147_v49 = vld [vmem:[%s4171_s6 + $0x38] sm:$0xff]  }
0x1046   :  { %2999 = vmatpush3.bf16.msra.mxu1 %v3144_v63 }
0x1047   :  { %3000 = vmatprep.subr.bf16.mxu1 %v3145_v29 }
0x104a   :  { %3001 = vmatpush3.bf16.msra.mxu1 %v3145_v29 }
0x104b   :  { %3002 = vmatprep.subr.bf16.mxu1 %v3146_v53 }
0x104e   :  { %3003 = vmatpush3.bf16.msra.mxu1 %v3146_v53 }
0x104f   :  { %3004 = vmatprep.subr.bf16.mxu1 %v3147_v49 }
0x1052   :  { %3005 = vmatpush3.bf16.msra.mxu1 %v3147_v49  ;;  %v2496_v49 = vrot.slane %v4104_v10, %v1237_v62 }
0x1118   :  { %v2988_v47 = vpop.f32.mrb[40].mxu1 }
0x1119   :  { %v2222_v51 = vpop.f32.mrb[41].mxu1  ;;  %v2238_v41 = vadd.f32 %v2988_v47, %v3834_v32  ;;  %v2297_v47 = vrot.slane %v4104_v10, %v1037_v8  ;;  %v2372_v8 = vrot.slane %v4104_v10, %v1112_v24 }
0x111a   :  { %v2236_v39 = vadd.f32 %v3816_v6, %v2222_v51  ;;  %v2989_v30 = vpop.f32.mrb[42].mxu1 }
0x111b   :  { %v2225_v40 = vpop.f32.mrb[43].mxu1  ;;  %v2245_v28 = vsel %vm114_vm0, %v2238_v41, 0.0 }
0x111c   :  { %v2237_v18 = vadd.f32 %v3821_v23, %v2225_v40  ;;  %v2239_v34 = vsel %vm114_vm0, %v2236_v39, 0.0 }
0x111d   :  { %2240 = vadd.xlane.f32.xlu0 %v2239_v34 }
0x111e   :  { %v2242_v38 = vsel %vm114_vm0, %v2237_v18, 0.0 }
0x111f   :  { %2243 = vadd.xlane.f32.xlu1 %v2242_v38 }
0x1121   :  { %2246 = vadd.xlane.f32.xlu0 %v2245_v28 }
0x11aa   :  { %v2241_v44 = vpop.xlane.xlu0 %2240 }
0x11ab   :  { %v2248_v13 = vmul.f32 0.03125, %v2241_v44 }
0x11ac   :  { %v2244_v26 = vpop.xlane.xlu1 %2243 }
0x11ad   :  { %v2251_v33 = vsub.f32 %v2236_v39, %v2248_v13  ;;  %v2249_v6 = vmul.f32 0.03125, %v2244_v26 }
0x11ae   :  { %v2247_v52 = vpop.xlane.xlu0 %2246 }
0x11af   :  { %v2252_v56 = vsub.f32 %v2237_v18, %v2249_v6  ;;  %v2250_v2 = vmul.f32 0.03125, %v2247_v52  ;;  %v2254_v32 = vmul.f32 %v2251_v33, %v2251_v33 }
0x11b1   :  { %v2253_v21 = vsub.f32 %v2238_v41, %v2250_v2  ;;  %v2257_v23 = vsel %vm114_vm0, %v2254_v32, 0.0  ;;  %v2255_v20 = vmul.f32 %v2252_v56, %v2252_v56 }
0x11b2   :  { %2258 = vadd.xlane.f32.xlu0 %v2257_v23 }
0x11b3   :  { %v2260_v57 = vsel %vm114_vm0, %v2255_v20, 0.0  ;;  %v2256_v58 = vmul.f32 %v2253_v21, %v2253_v21 }
0x11b4   :  { %2261 = vadd.xlane.f32.xlu1 %v2260_v57 }
0x11b5   :  { %v2263_v60 = vsel %vm114_vm0, %v2256_v58, 0.0 }
0x11b6   :  { %2264 = vadd.xlane.f32.xlu0 %v2263_v60 }
0x123f   :  { %v2259_v3 = vpop.xlane.xlu0 %2258 }
0x1240   :  { %v2266_v25 = vmul.f32 0.03125, %v2259_v3 }
0x1241   :  { %v2262_v37 = vpop.xlane.xlu1 %2261 }
0x1242   :  { %v2269_v7 = vadd.f32 1e-05, %v2266_v25  ;;  %v2267_v59 = vmul.f32 0.03125, %v2262_v37 }
0x1243   :  { %v2265_v14 = vpop.xlane.xlu0 %2264 }
0x1244   :  { %3256 = vrsqrt.f32 %v2269_v7  ;;  %v2270_v54 = vadd.f32 1e-05, %v2267_v59  ;;  %v2268_v15 = vmul.f32 0.03125, %v2265_v14 }
0x1246   :  { %3258 = vrsqrt.f32 %v2270_v54  ;;  %v2271_v5 = vadd.f32 1e-05, %v2268_v15 }
0x1248   :  { %3260 = vrsqrt.f32 %v2271_v5 }
0x124e   :  { %v3257_v9 = vpop.eup %3256 }
0x124f   :  { %v2275_v22 = vmul.f32 %v3257_v9, %v2251_v33 }
0x1250   :  { %v3259_v12 = vpop.eup %3258 }
0x1251   :  { %v2276_v16 = vmul.f32 %v3259_v12, %v2252_v56  ;;  %v2282_v27 = vmul.f32 %v2281_v19, %v2275_v22  ;;  %v3272_v22 = vld [vmem:[%s4167_s2] sm:$0x3] }
0x1252   :  { %v3261_v36 = vpop.eup %3260  ;;  %v1323_v12 = vsel %vm1322_vm7, %v3272_v22, 0.0 }
0x1253   :  { %v2277_v11 = vmul.f32 %v3261_v36, %v2253_v21  ;;  %v2283_v17 = vmul.f32 %v2281_v19, %v2276_v16  ;;  %v2289_v1 = vadd.f32 %v2288_v35, %v2282_v27  ;;  %v2648_v16 = vld [vmem:[%s4167_s2 + $0x2] sm:$0x3]  ;;  %s3383_s2 = smov [#allocation8]  }
0x1254   :  { %v2580_v27 = vsel %vm1322_vm7, %v2648_v16, 0.0  ;;  %s2594_s25 = sshll.u32 %s3383_s2, 4  ;;  %s2595_s25 = int_to_ptr.vmem [resolvable:$true] %s2594_s25 }
0x1255   :  { %v2284_v45 = vmul.f32 %v2281_v19, %v2277_v11  ;;  %v2290_v43 = vadd.f32 %v2288_v35, %v2283_v17  ;;  %s3339_s5 = scalar_lea.vmem %s2595_s25, 64  ;;  %p3344_p11 = scmp.lt.s32.totalorder %s2595_s25, %s2595_s25 }
0x1256   :  { %p3340_p10 = scmp.ne.s32.totalorder %s2595_s25, %s3339_s5  ;;  %p3345_p12 = scmp.lt.s32.totalorder %s3339_s5, %s3339_s5 }
0x1257   :  { %v2292_v31 = vpack.c.bf16 %v2290_v43, %v2289_v1  ;;  %v2291_v46 = vadd.f32 %v2288_v35, %v2284_v45 }
0x1258   :  { %p3346_p13 = por %p3345_p12, %p3344_p11 }
0x1259   :  { %2994 = vmatprep.mubr.msk.bf16.mxu0 %vm114_vm0, %v2292_v31  ;;  %v2293_v50 = vpack.c.bf16 %v2291_v46, %v2291_v46 }
0x125a   :  { %p3347_p0 = pnand %p3346_p13, %p3340_p10 }
0x125b   :  { %2995 = vmatmul.mubr.msk.bf16.vlgmr.msra.gmra.mrb[48].mxu0 %vm114_vm0, %v2293_v50 }
0x125c   :  { %3016 = vmatprep.mubr.msk.f32.mxu0 %vm3381_vm6, %v3382_v55 }
0x132e   :  { %v2996_v51 = vpop.f32.mrb[48].mxu0 }
0x132f   :  { %v2359_v39 = vadd.f32 %v2996_v51, %v2297_v47  ;;  %v2350_v30 = vpop.f32.mrb[49].mxu0 }
0x1330   :  { %v2351_v40 = vadd.f32 %v2350_v30, %v2297_v47  ;;  %v2997_v41 = vpop.f32.mrb[50].mxu0 }
0x1331   :  { %v2353_v18 = vpop.f32.mrb[51].mxu0  ;;  %v2366_v38 = vmax.f32 %v2359_v39, 0.0  ;;  %v2503_v41 = vrot.slane %v4104_v10, %v1244_v0 }
0x1332   :  { %v2354_v34 = vadd.f32 %v2353_v18, %v2297_v47  ;;  %v2364_v28 = vmax.f32 %v2351_v40, 0.0 }
0x1333   :  { %v2368_v26 = vpack.c.bf16 %v2366_v38, %v2366_v38 }
0x1334   :  { %v2365_v44 = vmax.f32 %v2354_v34, 0.0 }
0x1336   :  { %v2367_v13 = vpack.c.bf16 %v2365_v44, %v2364_v28 }
0x1338   :  { %3006 = vmatprep.mubr.msk.bf16.mxu1 %vm1138_vm5, %v2367_v13 }
0x1339   :  { %3007 = vmatmul.mubr.msk.bf16.vlgmr.msra.gmra.mrb[44].mxu1 %vm1138_vm5, %v2368_v26 }
0x140c   :  { %v3008_v33 = vpop.f32.mrb[44].mxu1 }
0x140d   :  { %v2437_v6 = vpop.f32.mrb[45].mxu1  ;;  %v2446_v52 = vadd.f32 %v3008_v33, %v2372_v8 }
0x140e   :  { %v2438_v56 = vadd.f32 %v2437_v6, %v2372_v8  ;;  %v3009_v2 = vpop.f32.mrb[46].mxu1 }
0x140f   :  { %v2440_v32 = vpop.f32.mrb[47].mxu1  ;;  %v2453_v20 = vadd.f32 %v2446_v52, %v2291_v46 }
0x1410   :  { %v2451_v21 = vadd.f32 %v2438_v56, %v2289_v1  ;;  %v2441_v23 = vadd.f32 %v2440_v32, %v2372_v8 }
0x1411   :  { %v2460_v42 = vsel %vm114_vm0, %v2453_v20, 0.0 }
0x1412   :  { %v2452_v57 = vadd.f32 %v2441_v23, %v2290_v43  ;;  %v2454_v58 = vsel %vm114_vm0, %v2451_v21, 0.0 }
0x1413   :  { %2455 = vadd.xlane.f32.xlu1 %v2454_v58 }
0x1414   :  { %v2457_v60 = vsel %vm114_vm0, %v2452_v57, 0.0 }
0x1415   :  { %2458 = vadd.xlane.f32.xlu0 %v2457_v60 }
0x1417   :  { %2461 = vadd.xlane.f32.xlu1 %v2460_v42 }
0x14a0   :  { %v2456_v24 = vpop.xlane.xlu1 %2455 }
0x14a1   :  { %v2463_v61 = vmul.f32 0.03125, %v2456_v24 }
0x14a2   :  { %v2459_v63 = vpop.xlane.xlu0 %2458 }
0x14a3   :  { %v2466_v29 = vsub.f32 %v2451_v21, %v2463_v61  ;;  %v2464_v3 = vmul.f32 0.03125, %v2459_v63 }
0x14a4   :  { %v2462_v25 = vpop.xlane.xlu1 %2461 }
0x14a5   :  { %v2467_v37 = vsub.f32 %v2452_v57, %v2464_v3  ;;  %v2465_v7 = vmul.f32 0.03125, %v2462_v25  ;;  %v2469_v59 = vmul.f32 %v2466_v29, %v2466_v29 }
0x14a7   :  { %v2468_v14 = vsub.f32 %v2453_v20, %v2465_v7  ;;  %v2472_v54 = vsel %vm114_vm0, %v2469_v59, 0.0  ;;  %v2470_v15 = vmul.f32 %v2467_v37, %v2467_v37 }
0x14a8   :  { %2473 = vadd.xlane.f32.xlu0 %v2472_v54 }
0x14a9   :  { %v2475_v5 = vsel %vm114_vm0, %v2470_v15, 0.0  ;;  %v2471_v19 = vmul.f32 %v2468_v14, %v2468_v14 }
0x14aa   :  { %2476 = vadd.xlane.f32.xlu1 %v2475_v5 }
0x14ab   :  { %v2478_v9 = vsel %vm114_vm0, %v2471_v19, 0.0 }
0x14ac   :  { %2479 = vadd.xlane.f32.xlu0 %v2478_v9 }
0x14ae   :  { %1324 = vadd.xlane.f32.xlu1 %v1323_v12 }
0x14b0   :  { %2581 = vadd.xlane.f32.xlu0 %v2580_v27 }
0x1535   :  { %v2474_v35 = vpop.xlane.xlu0 %2473 }
0x1536   :  { %v2481_v36 = vmul.f32 0.03125, %v2474_v35 }
0x1537   :  { %v2477_v11 = vpop.xlane.xlu1 %2476 }
0x1538   :  { %v2484_v17 = vadd.f32 1e-05, %v2481_v36  ;;  %v2482_v45 = vmul.f32 0.03125, %v2477_v11 }
0x1539   :  { %v2480_v1 = vpop.xlane.xlu0 %2479 }
0x153a   :  { %3262 = vrsqrt.f32 %v2484_v17  ;;  %v2485_v43 = vadd.f32 1e-05, %v2482_v45  ;;  %v2483_v31 = vmul.f32 0.03125, %v2480_v1 }
0x153b   :  { %v1325_v46 = vpop.xlane.xlu1 %1324 }
0x153c   :  { %3264 = vrsqrt.f32 %v2485_v43  ;;  %v2486_v50 = vadd.f32 1e-05, %v2483_v31  ;;  %v1326_v53 = vmax.f32 %v1325_v46, 1.0 }
0x153d   :  { %v2582_v48 = vpop.xlane.xlu0 %2581 }
0x153e   :  { %3266 = vrsqrt.f32 %v2486_v50  ;;  %v2583_v0 = vmax.f32 %v2582_v48, 1.0 }
0x153f   :  { %3268 = vrcp.f32 %v1326_v53 }
0x1540   :  { %3270 = vrcp.f32 %v2583_v0 }
0x1544   :  { %v3263_v47 = vpop.eup %3262 }
0x1545   :  { %v2490_v51 = vmul.f32 %v3263_v47, %v2466_v29 }
0x1546   :  { %v3265_v39 = vpop.eup %3264 }
0x1547   :  { %v2491_v30 = vmul.f32 %v3265_v39, %v2467_v37  ;;  %v2497_v40 = vmul.f32 %v2496_v49, %v2490_v51 }
0x1548   :  { %v3267_v18 = vpop.eup %3266 }
0x1549   :  { %v3269_v34 = vpop.eup %3268  ;;  %v2498_v38 = vmul.f32 %v2496_v49, %v2491_v30  ;;  %v2492_v28 = vmul.f32 %v3267_v18, %v2468_v14  ;;  %v2504_v13 = vadd.f32 %v2503_v41, %v2497_v40 }
0x154a   :  { %v1328_v44 = vmul.f32 %v3269_v34, %v3839_v4  ;;  %v3271_v10 = vpop.eup %3270 }
0x154b   :  { %v2505_v26 = vadd.f32 %v2503_v41, %v2498_v38  ;;  %v2499_v8 = vmul.f32 %v2496_v49, %v2492_v28 }
0x154c   :  { %2587 = vst.msk [vmem:[#allocation8] sm:$0x3] %vm2586_vm8, %v1328_v44 }
0x154d   :  { %v3023_v62 = vpack.c.bf16 %v2505_v26, %v2504_v13  ;;  %v2506_v33 = vadd.f32 %v2503_v41, %v2499_v8 }
0x154f   :  { %3024 = vmatpush3.bf16.msra.mxu0 %v3023_v62 }
0x1550   :  { %3014 = vmatprep.subr.mxu0 %v3382_v55 }
0x1553   :  { %3015 = vmatpush3.msra.mxu0 %v2506_v33 }
0x1554   :  { %3017 = vmatmul.mubr.msk.f32.vlgmr.msra.gmra.mrb[26].mxu0 %vm472_vm2, %v2648_v16 }
0x1627   :  { %v2576_v4 = vpop.f32.mrb[26].mxu0 }
0x1628   :  { %v2585_v6 = vmul.f32 %v3271_v10, %v2576_v4  ;;  %v3018_v52 = vpop.f32.mrb[27].mxu0 }
0x162a   :  { %2588 = vst.msk [vmem:[#allocation8 + $0x2] sm:$0x3] %vm2586_vm8, %v2585_v6 }
0x162b   :  { %3350 = shalt.err (!%p3347_p0)
}
0x162c   :  { %s3351_s28 = scalar_lea.hbm %s4173_s8, 64 }
0x162d   :  { %p3352_p1 = scmp.ne.s32.totalorder %s4173_s8, %s3351_s28  ;;  %p3355_p2 = scmp.lt.u32.totalorder %s3351_s28, %s4173_s8 }
0x162f   :  { %p3357_p3 = pnand %p3355_p2, %p3352_p1 }
0x1631   :  { %3360 = shalt.err (!%p3357_p3)
}
0x1632   :  { %s3384_s0 = smov 32   ;;  %s3385_s17 = smov 2  }
0x1633   :  { %2600 = dma.vmem_to_hbm [thread:$0]  %s2595_s25, 64, %s4173_s8, [#allocation4], %s3384_s0, %s3384_s0, %s3385_s17  }
0x1634   :  { %3365 = dma.done.wait [#allocation4], 64  }
0x1635   :  { %3366 = vsyncadd [#allocation4], 4294967232 }
0x1636   :  { %2604 = vsyncpa [#allocation3], 1 }
0x1637   :  { %2605 = vsyncpa [#allocation6], 1 }
0x1638   :  { %2606 = vsyncpa [#allocation4], 1 }

</bundles_post_ra>
